<compile_context>
chip_gen: v5e
topology: v5e:2x2
jax: 0.10.0
libtpu: 0.0.40
codegen_flags: <defaults>
</compile_context>

<pallas_src>
import math
from functools import partial

import jax
import jax.numpy as jnp
from jax import lax
from jax.experimental import pallas as pl
from jax.experimental.pallas import tpu as pltpu


# ----------------------------------------------------------------------------
# Generation-aware scoped-VMEM limit
# ----------------------------------------------------------------------------
def _vmem_limit_bytes():
    # ~75% of physical VMEM, capped at 100 MiB (v5e/v6e: 128 MiB phys -> 96 MiB,
    # v7x: 64 MiB phys -> 48 MiB).  Falls back to a v7x-safe 48 MiB.
    try:
        cap = pltpu.get_tpu_info().vmem_capacity_bytes
        return int(min(cap * 3 // 4, 100 * 1024 * 1024))
    except Exception:
        return 48 * 1024 * 1024


_VMEM_LIMIT = _vmem_limit_bytes()
_CPARAMS = lambda: pltpu.CompilerParams(
    dimension_semantics=("parallel",), vmem_limit_bytes=_VMEM_LIMIT)

PRELU_A = 0.25  # nn.PReLU() default slope (kept constant; learned slope ignored)


# ----------------------------------------------------------------------------
# In-kernel helpers
# ----------------------------------------------------------------------------
def _act_fn(x, act):
    if act == "prelu":
        return jnp.where(x >= 0, x, PRELU_A * x)
    if act == "sigmoid":
        return 1.0 / (1.0 + jnp.exp(-x))
    if act == "relu":
        return jnp.maximum(x, 0.0)
    return x


def _gelu_tanh(x):
    # TODO(synk): PyTorch F.gelu default is exact (erf); tanh approximation
    # used here for EUP-friendly in-kernel lowering.
    c = 0.7978845608028654  # sqrt(2/pi)
    return 0.5 * x * (1.0 + jnp.tanh(c * (x + 0.044715 * (x * x * x))))


def _pick_tm(M):
    # >=2 grid steps whenever possible (v7x: 2 TensorCores); 128-aligned tiles
    # preferred (v5e 4x128 MXU).  Returning M (full extent) is always legal.
    for tm in (512, 256, 128, 64, 32, 16, 8):
        if M % tm == 0 and M // tm >= 2:
            return tm
    return M


# ----------------------------------------------------------------------------
# Pallas kernels
# ----------------------------------------------------------------------------
def _make_mm_kernel(act):
    def kernel(a_ref, w_ref, b_ref, o_ref):
        acc = jnp.dot(a_ref[...], w_ref[...], preferred_element_type=jnp.float32)
        acc = _act_fn(acc + b_ref[...], act)
        o_ref[...] = acc.astype(o_ref.dtype)
    return kernel


@partial(jax.jit, static_argnames=("act", "out_dtype"))
def _mm_call(a, w, b, act="none", out_dtype="bfloat16"):
    """(M,K)@(K,N) on the MXU with fused bias + activation, bf16 store."""
    M, K = a.shape
    N = w.shape[1]
    tm = _pick_tm(M)
    return pl.pallas_call(
        _make_mm_kernel(act),
        out_shape=jax.ShapeDtypeStruct((M, N), jnp.dtype(out_dtype)),
        grid=(M // tm,),
        in_specs=[pl.BlockSpec((tm, K), lambda i: (i, 0)),
                  pl.BlockSpec((K, N), lambda i: (0, 0)),
                  pl.BlockSpec((1, N), lambda i: (0, 0))],
        out_specs=pl.BlockSpec((tm, N), lambda i: (i, 0)),
        compiler_params=_CPARAMS(),
    )(a, w, b)


def _mm_geglu_kernel(a_ref, wa_ref, wb_ref, o_ref):
    a = a_ref[...]
    h1 = jnp.dot(a, wa_ref[...], preferred_element_type=jnp.float32)
    h2 = jnp.dot(a, wb_ref[...], preferred_element_type=jnp.float32)
    o_ref[...] = (_gelu_tanh(h1) * h2).astype(o_ref.dtype)


@jax.jit
def _mm_geglu_call(a, wa, wb):
    M, K = a.shape
    N = wa.shape[1]
    tm = _pick_tm(M)
    return pl.pallas_call(
        _mm_geglu_kernel,
        out_shape=jax.ShapeDtypeStruct((M, N), jnp.bfloat16),
        grid=(M // tm,),
        in_specs=[pl.BlockSpec((tm, K), lambda i: (i, 0)),
                  pl.BlockSpec((K, N), lambda i: (0, 0)),
                  pl.BlockSpec((K, N), lambda i: (0, 0))],
        out_specs=pl.BlockSpec((tm, N), lambda i: (i, 0)),
        compiler_params=_CPARAMS(),
    )(a, wa, wb)


def _make_conv3_kernel(act):
    # 3x3 conv, stride 1, pad 1: 9 shifted reads of the padded VMEM tile feed
    # 9 accumulating MXU matmuls; bias + activation fused; no HBM im2col.
    def kernel(x_ref, w_ref, b_ref, o_ref):
        H, W, Cout = o_ref.shape[1], o_ref.shape[2], o_ref.shape[3]
        Cin = x_ref.shape[3]
        x = x_ref[0]                                   # (H+2, W+2, Cin)
        acc = jnp.zeros((H * W, Cout), jnp.float32)
        for t in range(9):
            dy, dx = t // 3, t % 3
            xt = x[dy:dy + H, dx:dx + W, :].reshape(H * W, Cin)
            acc = acc + jnp.dot(xt, w_ref[t * Cin:(t + 1) * Cin, :],
                                preferred_element_type=jnp.float32)
        acc = _act_fn(acc + b_ref[...], act)
        o_ref[0] = acc.reshape(H, W, Cout).astype(o_ref.dtype)
    return kernel


@partial(jax.jit, static_argnames=("act", "out_dtype"))
def _conv3_call(xpad, w, b, act="none", out_dtype="bfloat16"):
    B, Hp, Wp, Cin = xpad.shape
    H, W = Hp - 2, Wp - 2
    Cout = w.shape[1]
    return pl.pallas_call(
        _make_conv3_kernel(act),
        out_shape=jax.ShapeDtypeStruct((B, H, W, Cout), jnp.dtype(out_dtype)),
        grid=(B,),
        in_specs=[pl.BlockSpec((1, Hp, Wp, Cin), lambda i: (i, 0, 0, 0)),
                  pl.BlockSpec((9 * Cin, Cout), lambda i: (0, 0)),
                  pl.BlockSpec((1, Cout), lambda i: (0, 0))],
        out_specs=pl.BlockSpec((1, H, W, Cout), lambda i: (i, 0, 0, 0)),
        compiler_params=_CPARAMS(),
    )(xpad, w, b)


def _conv3_geglu_kernel(x_ref, wa_ref, wb_ref, o_ref):
    # Fused GDFN front end: (1x1 -> dw3x3) composed weight, both halves
    # accumulated in f32, gelu(x1)*x2 stored (halves the hidden HBM write).
    H, W, Ch = o_ref.shape[1], o_ref.shape[2], o_ref.shape[3]
    Cin = x_ref.shape[3]
    x = x_ref[0]
    acc_a = jnp.zeros((H * W, Ch), jnp.float32)
    acc_b = jnp.zeros((H * W, Ch), jnp.float32)
    for t in range(9):
        dy, dx = t // 3, t % 3
        xt = x[dy:dy + H, dx:dx + W, :].reshape(H * W, Cin)
        acc_a = acc_a + jnp.dot(xt, wa_ref[t * Cin:(t + 1) * Cin, :],
                                preferred_element_type=jnp.float32)
        acc_b = acc_b + jnp.dot(xt, wb_ref[t * Cin:(t + 1) * Cin, :],
                                preferred_element_type=jnp.float32)
    o_ref[0] = (_gelu_tanh(acc_a) * acc_b).reshape(H, W, Ch).astype(o_ref.dtype)


@jax.jit
def _conv3_geglu_call(xpad, wa, wb):
    B, Hp, Wp, Cin = xpad.shape
    H, W = Hp - 2, Wp - 2
    Ch = wa.shape[1]
    return pl.pallas_call(
        _conv3_geglu_kernel,
        out_shape=jax.ShapeDtypeStruct((B, H, W, Ch), jnp.bfloat16),
        grid=(B,),
        in_specs=[pl.BlockSpec((1, Hp, Wp, Cin), lambda i: (i, 0, 0, 0)),
                  pl.BlockSpec((9 * Cin, Ch), lambda i: (0, 0)),
                  pl.BlockSpec((9 * Cin, Ch), lambda i: (0, 0))],
        out_specs=pl.BlockSpec((1, H, W, Ch), lambda i: (i, 0, 0, 0)),
        compiler_params=_CPARAMS(),
    )(xpad, wa, wb)


def _attn_kernel(q_ref, k_ref, v_ref, t_ref, o_ref):
    # Fused MDTA channel attention, all heads in one block:
    # l2-normalize q,k, fold temperature into q, softmax(q @ k^T) @ v.
    q = q_ref[0].astype(jnp.float32)          # (heads, ch, HW)
    k = k_ref[0].astype(jnp.float32)
    v = v_ref[0].astype(jnp.float32)

    def l2n(t):
        n = jnp.sqrt(jnp.sum(t * t, axis=-1, keepdims=True))
        return t / jnp.maximum(n, 1e-12)

    qn = l2n(q) * t_ref[...]                  # temperature (heads,1,1)
    kn = l2n(k)
    s = jnp.einsum("hcp,hdp->hcd", qn, kn, preferred_element_type=jnp.float32)
    s = s - jnp.max(s, axis=-1, keepdims=True)
    e = jnp.exp(s)
    p = e * pl.reciprocal(jnp.sum(e, axis=-1, keepdims=True), approx=True)
    o = jnp.einsum("hcd,hdp->hcp", p, v, preferred_element_type=jnp.float32)
    o_ref[0] = o.astype(o_ref.dtype)


@jax.jit
def _attn_call(q, k, v, temp):
    B, h, ch, HW = q.shape
    spec = pl.BlockSpec((1, h, ch, HW), lambda b: (b, 0, 0, 0))
    return pl.pallas_call(
        _attn_kernel,
        out_shape=jax.ShapeDtypeStruct((B, h, ch, HW), jnp.bfloat16),
        grid=(B,),
        in_specs=[spec, spec, spec,
                  pl.BlockSpec((h, 1, 1), lambda b: (0, 0, 0))],
        out_specs=spec,
        compiler_params=_CPARAMS(),
    )(q, k, v, temp)


# ----------------------------------------------------------------------------
# One-time weight preparation (PyTorch layouts -> bf16 matmul layouts)
# ----------------------------------------------------------------------------
def _dw_taps(dw_w):  # (C,1,3,3) -> (9, C)
    C = dw_w.shape[0]
    return jnp.transpose(dw_w[:, 0], (1, 2, 0)).reshape(9, C)


def prep_conv3(w, b=None):
    """Standard 3x3 conv weight (Cout,Cin,3,3) -> (9*Cin, Cout) bf16."""
    Cout, Cin = int(w.shape[0]), int(w.shape[1])
    wm = jnp.transpose(w, (2, 3, 1, 0)).reshape(9 * Cin, Cout)
    bias = jnp.zeros((Cout,), jnp.float32) if b is None else b
    return dict(w=wm.astype(jnp.bfloat16), b=bias.reshape(1, Cout).astype(jnp.float32))


def prep_conv1(w, b=None):
    """1x1 conv (Cout,Cin,1,1) -> (Cin, Cout) bf16."""
    Cout, Cin = int(w.shape[0]), int(w.shape[1])
    wm = jnp.transpose(w.reshape(Cout, Cin))
    bias = jnp.zeros((Cout,), jnp.float32) if b is None else b
    return dict(w=wm.astype(jnp.bfloat16), b=bias.reshape(1, Cout).astype(jnp.float32))


def prep_dsc(dw_w, dw_b, pw_w, pw_b):
    """Depthwise 3x3 (+bias) followed by pointwise 1x1 (+bias), folded exactly
    into ONE 3x3 conv on the MXU:
      W[t,ci,co] = dw[t,ci] * pw[ci,co];  b[co] = pw_b[co] + sum_ci dw_b[ci]*pw[ci,co]."""
    C, Co = int(dw_w.shape[0]), int(pw_w.shape[0])
    taps = _dw_taps(dw_w)                              # (9, C)
    pwm = jnp.transpose(pw_w.reshape(Co, C))           # (C, Co)
    W = (taps[:, :, None] * pwm[None, :, :]).reshape(9 * C, Co)
    bias = pw_b + jnp.dot(dw_b, pwm)
    return dict(w=W.astype(jnp.bfloat16), b=bias.reshape(1, Co).astype(jnp.float32))


def _fuse_pw_dw(pw_w, dw_w):
    """Bias-free 1x1 followed by depthwise 3x3 folded into one 3x3 conv:
    W[t,ci,m] = dw[t,m] * pw[ci,m].  Exact because the 1x1 has no bias."""
    Cm, Ci = int(pw_w.shape[0]), int(pw_w.shape[1])
    taps = _dw_taps(dw_w)                               # (9, Cm)
    pwm = jnp.transpose(pw_w.reshape(Cm, Ci))           # (Ci, Cm)
    return (taps[:, None, :] * pwm[None, :, :]).reshape(9 * Ci, Cm)


def prep_pw_dw(pw_w, dw_w):
    W = _fuse_pw_dw(pw_w, dw_w)
    return dict(w=W.astype(jnp.bfloat16),
                b=jnp.zeros((1, W.shape[1]), jnp.float32))


def prep_ffn_in(pw_w, dw_w, hidden):
    W = _fuse_pw_dw(pw_w, dw_w)
    return dict(wa=W[:, :hidden].astype(jnp.bfloat16),
                wb=W[:, hidden:].astype(jnp.bfloat16))


def prep_convT(w_t):
    """ConvTranspose2d(k=3, s=2, p=1, op=1, no bias) as one sub-pixel matmul."""
    Cin, Cout = int(w_t.shape[0]), int(w_t.shape[1])
    contrib = {0: ((0, 1),), 1: ((1, 0), (0, 2))}
    W = jnp.zeros((2, 2, Cin, 2, 2, Cout), jnp.float32)
    for r in (0, 1):
        for di, kh in contrib[r]:
            for s in (0, 1):
                for dj, kw in contrib[s]:
                    W = W.at[di, dj, :, r, s, :].add(w_t[:, :, kh, kw])
    return dict(w=W.reshape(4 * Cin, 4 * Cout).astype(jnp.bfloat16),
                b=jnp.zeros((1, 4 * Cout), jnp.float32), cout=Cout)


def prep_ca(w1, w2):
    """CALayer 1x1 convs; kept f32 (the whole CA layer runs in XLA)."""
    c_red, c = int(w1.shape[0]), int(w1.shape[1])
    return dict(w1=jnp.transpose(w1.reshape(c_red, c)),
                w2=jnp.transpose(w2.reshape(c, c_red)))


# ----------------------------------------------------------------------------
# Conv / elementwise building blocks
# ----------------------------------------------------------------------------
def _im2col3(x, stride=1):
    B, H, W, C = x.shape
    xp = jnp.pad(x, ((0, 0), (1, 1), (1, 1), (0, 0)))
    Ho = (H + 2 - 3) // stride + 1
    Wo = (W + 2 - 3) // stride + 1
    cols = []
    for dy in range(3):
        for dx in range(3):
            cols.append(xp[:, dy:dy + stride * (Ho - 1) + 1:stride,
                           dx:dx + stride * (Wo - 1) + 1:stride, :])
    return jnp.concatenate(cols, axis=-1), Ho, Wo


def conv1x1(x, p, act="none", out_dtype="bfloat16"):
    B, H, W, Cin = x.shape
    Cout = p["w"].shape[1]
    y = _mm_call(x.reshape(B * H * W, Cin).astype(jnp.bfloat16), p["w"], p["b"],
                 act=act, out_dtype=out_dtype)
    return y.reshape(B, H, W, Cout)


def conv3x3(x, p, act="none", out_dtype="bfloat16"):
    """3x3 conv (pad 1, stride 1) + bias + activation.  Lane-layout-friendly
    widths take the fused in-kernel-shift path; small/odd widths fall back to
    XLA-side im2col + fused matmul (tiny tensors only)."""
    B, H, W, Cin = x.shape
    Cout = p["w"].shape[1]
    xb = x.astype(jnp.bfloat16)
    if W % 8 == 0:
        xpad = jnp.pad(xb, ((0, 0), (1, 1), (1, 1), (0, 0)))
        return _conv3_call(xpad, p["w"], p["b"], act=act, out_dtype=out_dtype)
    patches, Ho, Wo = _im2col3(xb, stride=1)
    y = _mm_call(patches.reshape(B * Ho * Wo, 9 * Cin), p["w"], p["b"],
                 act=act, out_dtype=out_dtype)
    return y.reshape(B, Ho, Wo, Cout)


def conv3x3_s2(x, p, act="none"):
    # Stride-2 3x3 conv (HRM down_R).  TODO(synk): move the strided tap gather
    # into the kernel (strided VMEM reads) instead of XLA-side im2col.
    B, H, W, Cin = x.shape
    Cout = p["w"].shape[1]
    patches, Ho, Wo = _im2col3(x.astype(jnp.bfloat16), stride=2)
    y = _mm_call(patches.reshape(B * Ho * Wo, 9 * Cin), p["w"], p["b"], act=act)
    return y.reshape(B, Ho, Wo, Cout)


def convT_apply(x, p, act="prelu"):
    """ConvTranspose2d(k=3, s=2, p=1, op=1) via sub-pixel matmul (+fused PReLU;
    PReLU is elementwise so applying it before the sub-pixel shuffle is exact)."""
    B, H, W, Cin = x.shape
    Cout = p["cout"]
    xp = jnp.pad(x.astype(jnp.bfloat16), ((0, 0), (0, 1), (0, 1), (0, 0)))
    patches = jnp.concatenate(
        [xp[:, :H, :W], xp[:, :H, 1:W + 1],
         xp[:, 1:H + 1, :W], xp[:, 1:H + 1, 1:W + 1]], axis=-1)      # (B,H,W,4Cin)
    y = _mm_call(patches.reshape(B * H * W, 4 * Cin), p["w"], p["b"], act=act)
    y = y.reshape(B, H, W, 2, 2, Cout)
    return jnp.transpose(y, (0, 1, 3, 2, 4, 5)).reshape(B, 2 * H, 2 * W, Cout)


def resize_bilinear(x, scale):
    B, H, W, C = x.shape
    Hn, Wn = int(math.floor(H * scale)), int(math.floor(W * scale))
    return jax.image.resize(x, (B, Hn, Wn, C), method="bilinear", antialias=False)


def resize_bicubic(x, size):
    B, H, W, C = x.shape
    if (H, W) == tuple(size):
        return x
    # TODO(synk): PyTorch bicubic uses a=-0.75; jax 'cubic' uses Keys a=-0.5.
    return jax.image.resize(x, (B, size[0], size[1], C), method="cubic", antialias=False)


# ----------------------------------------------------------------------------
# Module forwards
# ----------------------------------------------------------------------------
def ca_forward(x, p):  # CALayer: tiny matmuls, kept in plain XLA (launch-bound)
    xf = x.astype(jnp.float32)
    y = jnp.mean(xf, axis=(1, 2))                       # (B, C)
    y = jnp.maximum(jnp.dot(y, p["w1"]), 0.0)
    y = jax.nn.sigmoid(jnp.dot(y, p["w2"]))
    return (xf * y[:, None, None, :]).astype(x.dtype)


def cab_forward(x, p):  # CAB_dsc (every DSC = one fused 3x3 MXU conv)
    res = conv3x3(x, p["b1"], act="prelu")              # DSC + PReLU fused
    res = conv3x3(res, p["b2"])                         # DSC
    res = ca_forward(res, p["ca"])
    fea = conv3x3(jnp.concatenate([res, x], axis=-1), p["s2fb"]["dsc"])
    return ca_forward(fea, p["s2fb"]["ca"]) + res


def crb_forward(xB_res, xR_res, p):  # CRB (sigmoid fused into the 1x1 convs)
    g_btor = conv1x1(xR_res, p["btor"], act="sigmoid")
    g_rtob = conv1x1(xB_res, p["rtob"], act="sigmoid")
    res_BTOR = xB_res * g_btor * p["fw_btor"]
    res_RTOB = xR_res * g_rtob * p["fw_rtob"]
    xb = (xB_res - res_BTOR + res_RTOB).astype(jnp.bfloat16)
    xr = (xR_res - res_RTOB + res_BTOR).astype(jnp.bfloat16)
    return xb, xr


def lfsfb_forward(x1, x2, p):  # LFSFB (PReLU fused into both matmuls)
    res = conv1x1(x1, p["fs"], act="prelu")
    return convT_apply(x2 + res, p["ffu"], act="prelu")


def layernorm_c(x, w, b):  # Restormer 'WithBias' LayerNorm over channels (f32 math)
    xf = x.astype(jnp.float32)
    mu = jnp.mean(xf, axis=-1, keepdims=True)
    var = jnp.mean((xf - mu) ** 2, axis=-1, keepdims=True)
    return ((xf - mu) * lax.rsqrt(var + 1e-5) * w + b).astype(x.dtype)


def attention_forward(x, p, heads):  # MDTA
    B, H, W, C = x.shape
    qkv = conv3x3(x, p["qkv"])        # fused (1x1 -> dw3x3) composed conv, C -> 3C
    q, k, v = jnp.split(qkv, 3, axis=-1)
    ch = C // heads

    def tohead(t):
        return jnp.transpose(t.reshape(B, H * W, heads, ch), (0, 2, 3, 1))

    out = _attn_call(tohead(q), tohead(k), tohead(v), p["temp"])
    out = jnp.transpose(out, (0, 3, 1, 2)).reshape(B, H, W, C)
    return conv1x1(out, p["proj"])


def feedforward_forward(x, p):  # GDFN
    B, H, W, C = x.shape
    hid = p["inp"]["wa"].shape[1]
    xb = x.astype(jnp.bfloat16)
    if W % 8 == 0:
        xpad = jnp.pad(xb, ((0, 0), (1, 1), (1, 1), (0, 0)))
        h = _conv3_geglu_call(xpad, p["inp"]["wa"], p["inp"]["wb"])
    else:
        patches, Ho, Wo = _im2col3(xb, stride=1)
        h = _mm_geglu_call(patches.reshape(B * Ho * Wo, -1),
                           p["inp"]["wa"], p["inp"]["wb"]).reshape(B, Ho, Wo, hid)
    return conv1x1(h, p["out"])


def restormer_block(x, p, heads=2):
    x = x + attention_forward(layernorm_c(x, p["n1_w"], p["n1_b"]), p, heads)
    x = x + feedforward_forward(layernorm_c(x, p["n2_w"], p["n2_b"]), p["ffn"])
    return x


def hrm_forward(xB, xR, p):  # HRM
    res_down_R = conv3x3_s2(xR, p["down_R"], act="prelu")
    res_R = res_down_R
    for bp in p["body"]:
        res_R = restormer_block(res_R, bp, heads=2)
    lf = lfsfb_forward(res_down_R, res_R, p["lfsfb"])
    cab_r_out = cab_forward(xR, p["cab_r"])
    xR_res = cab_r_out + resize_bicubic(lf, (cab_r_out.shape[1], cab_r_out.shape[2]))
    xB_res = cab_forward(xB, p["cab_b"])
    return crb_forward(xB_res, xR_res, p["crb"])


def model_forward(params, x_nchw):
    x = jnp.transpose(x_nchw, (0, 2, 3, 1)).astype(jnp.bfloat16)  # -> NHWC bf16
    # PatchEmbed
    x_fea = conv3x3(x, params["patch"]["proj"])
    # TODO(synk): B/R branches could be stacked on a leading axis to halve
    # launch counts; kept separate here for clarity.
    B_fea = conv3x3(x_fea, params["patch"]["sb"])
    R_fea = conv3x3(x_fea, params["patch"]["sr"])
    # crb_0
    out_B_0, out_R_0 = hrm_forward(B_fea, R_fea, params["crb_0"])
    # down0_1 (bilinear 0.5 + 1x1 conv)
    B_down_1 = conv1x1(resize_bilinear(B_fea, 0.5), params["down0_1"]["b"])
    R_down_1 = conv1x1(resize_bilinear(R_fea, 0.5), params["down0_1"]["r"])
    out_B_1, out_R_1 = hrm_forward(B_down_1, R_down_1, params["crb_1"])
    B_up1_0 = conv1x1(resize_bilinear(out_B_1, 2.0), params["up1_0"]["b"])
    R_up1_0 = conv1x1(resize_bilinear(out_R_1, 2.0), params["up1_0"]["r"])
    # down0_2
    B_down_2 = conv1x1(resize_bilinear(B_fea, 0.25), params["down0_2"]["b"])
    R_down_2 = conv1x1(resize_bilinear(R_fea, 0.25), params["down0_2"]["r"])
    out_B_2, out_R_2 = hrm_forward(B_down_2, R_down_2, params["crb_2"])
    B_up2_0 = conv1x1(resize_bilinear(out_B_2, 4.0), params["up2_0"]["b"])
    R_up2_0 = conv1x1(resize_bilinear(out_R_2, 4.0), params["up2_0"]["r"])
    Ht, Wt = out_B_0.shape[1], out_B_0.shape[2]
    B_cat = jnp.concatenate(
        [out_B_0, resize_bicubic(B_up1_0, (Ht, Wt)), resize_bicubic(B_up2_0, (Ht, Wt))], axis=-1)
    R_cat = jnp.concatenate(
        [out_R_0, resize_bicubic(R_up1_0, (Ht, Wt)), resize_bicubic(R_up2_0, (Ht, Wt))], axis=-1)
    B_fuse = conv1x1(B_cat, params["pc_B"])
    # NB: the PyTorch reference reuses point_conv_B for R_cat (kept intentionally).
    R_fuse = conv1x1(R_cat, params["pc_B"])
    xb, xr = B_fuse, R_fuse
    for hp in params["crb_3"]:
        xb, xr = hrm_forward(xb, xr, hp)
    # RRB (final reconstructions kept in f32)
    recon_B = conv3x3(xb, params["rrb"]["b"], out_dtype="float32")
    recon_R = conv3x3(xr, params["rrb"]["r"], out_dtype="float32")
    re_rain = recon_B + recon_R
    to_nchw = lambda t: jnp.transpose(t, (0, 3, 1, 2))
    return to_nchw(recon_B), to_nchw(re_rain), to_nchw(recon_R)


# ----------------------------------------------------------------------------
# Deterministic parameter construction
# ----------------------------------------------------------------------------
class KeyGen:
    def __init__(self, seed=0):
        self._k = jax.random.PRNGKey(seed)

    def __call__(self):
        self._k, sub = jax.random.split(self._k)
        return sub


KEYS = KeyGen(0)


def rand(shape, scale=None):
    if scale is None:
        fan = 1
        for d in shape[1:]:
            fan *= d
        scale = 1.0 / math.sqrt(max(fan, 1))
    return jax.random.normal(KEYS(), shape, jnp.float32) * scale


def p_dsc(ci, co):
    return prep_dsc(rand((ci, 1, 3, 3)), rand((ci,), 0.01),
                    rand((co, ci, 1, 1)), rand((co,), 0.01))


def p_ca(c, r):
    return prep_ca(rand((c // r, c, 1, 1)), rand((c, c // r, 1, 1)))


def p_cab(n, r):
    return dict(b1=p_dsc(n, n), b2=p_dsc(n, n), ca=p_ca(n, r),
                s2fb=dict(dsc=p_dsc(2 * n, n), ca=p_ca(n, r)))


def p_restormer(dim, heads=2, ffn_factor=2.66):
    hidden = int(dim * ffn_factor)
    return dict(
        n1_w=jnp.ones((dim,), jnp.float32), n1_b=jnp.zeros((dim,), jnp.float32),
        temp=jnp.ones((heads, 1, 1), jnp.float32),
        qkv=prep_pw_dw(rand((3 * dim, dim, 1, 1)), rand((3 * dim, 1, 3, 3))),
        proj=prep_conv1(rand((dim, dim, 1, 1))),
        n2_w=jnp.ones((dim,), jnp.float32), n2_b=jnp.zeros((dim,), jnp.float32),
        ffn=dict(inp=prep_ffn_in(rand((2 * hidden, dim, 1, 1)),
                                 rand((2 * hidden, 1, 3, 3)), hidden),
                 out=prep_conv1(rand((dim, hidden, 1, 1)))),
    )


def p_hrm(n, r, num_rb):
    return dict(
        cab_r=p_cab(n, r), cab_b=p_cab(n, r),
        down_R=prep_conv3(rand((n, n, 3, 3))),
        body=[p_restormer(n) for _ in range(num_rb)],
        lfsfb=dict(fs=prep_conv1(rand((n, n, 1, 1))), ffu=prep_convT(rand((n, n, 3, 3)))),
        crb=dict(btor=prep_conv1(rand((n, n, 1, 1))), rtob=prep_conv1(rand((n, n, 1, 1))),
                 fw_btor=jnp.float32(0.2), fw_rtob=jnp.float32(0.2)),
    )


def build_model_params(in_c=3, n_feat=8, reduction=4):
    n = n_feat
    return dict(
        patch=dict(proj=prep_conv3(rand((n, in_c, 3, 3))), sb=p_dsc(n, n), sr=p_dsc(n, n)),
        down0_1=dict(b=prep_conv1(rand((2 * n, n, 1, 1))), r=prep_conv1(rand((2 * n, n, 1, 1)))),
        down0_2=dict(b=prep_conv1(rand((4 * n, n, 1, 1))), r=prep_conv1(rand((4 * n, n, 1, 1)))),
        crb_0=p_hrm(n, reduction, 8),
        crb_1=p_hrm(2 * n, reduction, 4),
        crb_2=p_hrm(4 * n, reduction, 4),
        crb_3=[p_hrm(n, reduction, 4) for _ in range(3)],
        up1_0=dict(b=prep_conv1(rand((n, 2 * n, 1, 1))), r=prep_conv1(rand((n, 2 * n, 1, 1)))),
        up2_0=dict(b=prep_conv1(rand((n, 4 * n, 1, 1))), r=prep_conv1(rand((n, 4 * n, 1, 1)))),
        pc_B=prep_conv1(rand((n, 3 * n, 1, 1)), rand((n,), 0.01)),
        # pc_R mirrors the reference parameters but is intentionally unused:
        # the reference forward reuses point_conv_B for R_cat (do not "fix").
        pc_R=prep_conv1(rand((n, 3 * n, 1, 1)), rand((n,), 0.01)),
        rrb=dict(b=prep_conv3(rand((3, n, 3, 3))), r=prep_conv3(rand((3, n, 3, 3)))),
    )


# ----------------------------------------------------------------------------
if __name__ == "__main__":
    params = build_model_params(in_c=3, n_feat=8, reduction=4)
    x = jax.random.normal(jax.random.PRNGKey(0), (2, 3, 16, 16), jnp.float32)

    img_B, img_R, streak = model_forward(params, x)
    (img_B, img_R, streak) = jax.block_until_ready((img_B, img_R, streak))

    assert img_B.shape == (2, 3, 16, 16)
    assert img_R.shape == (2, 3, 16, 16)
    assert streak.shape == (2, 3, 16, 16)
    assert bool(jnp.all(jnp.isfinite(img_B)))
    assert bool(jnp.all(jnp.isfinite(img_R)))
    assert bool(jnp.all(jnp.isfinite(streak)))
    print("KERNEL_OK")
</pallas_src>

<mosaic_0001>
module attributes {stable_mosaic.version = 11 : i64} {
  func.func @kernel(%arg0: i32, %arg1: memref<1x18x18x3xbf16, #tpu.memory_space<vmem>>, %arg2: memref<27x8xbf16, #tpu.memory_space<vmem>>, %arg3: memref<1x8xf32, #tpu.memory_space<vmem>>, %arg4: memref<1x16x16x8xbf16, #tpu.memory_space<vmem>>) attributes {dimension_semantics = [#tpu.dimension_semantics<parallel>], iteration_bounds = array<i64: 2>, scalar_prefetch = 0 : i64, scratch_operands = 0 : i64, tpu.core_type = #tpu.core_type<tc>, window_params = [{transform_indices = @transform_0, window_bounds = array<i64: 1, 18, 18, 3>}, {pipeline_mode = #tpu.pipeline_mode<synchronous>, transform_indices = @transform_1, window_bounds = array<i64: 27, 8>}, {pipeline_mode = #tpu.pipeline_mode<synchronous>, transform_indices = @transform_2, window_bounds = array<i64: 1, 8>}, {transform_indices = @transform_3, window_bounds = array<i64: 1, 16, 16, 8>}]} {
    %c0 = arith.constant 0 : index
    %c0_0 = arith.constant 0 : index
    %c0_1 = arith.constant 0 : index
    %c0_2 = arith.constant 0 : index
    %0 = vector.load %arg1[%c0, %c0_0, %c0_1, %c0_2] : memref<1x18x18x3xbf16, #tpu.memory_space<vmem>>, vector<1x18x18x3xbf16>
    %1 = vector.shape_cast %0 : vector<1x18x18x3xbf16> to vector<18x18x3xbf16>
    %cst = arith.constant 0.000000e+00 : f32
    %2 = vector.broadcast %cst : f32 to vector<256x8xf32>
    %3 = vector.extract_strided_slice %1 {offsets = [0, 0, 0], sizes = [16, 16, 3], strides = [1, 1, 1]} : vector<18x18x3xbf16> to vector<16x16x3xbf16>
    %4 = vector.shape_cast %3 : vector<16x16x3xbf16> to vector<256x3xbf16>
    %c0_3 = arith.constant 0 : index
    %c0_4 = arith.constant 0 : index
    %5 = vector.load %arg2[%c0_3, %c0_4] : memref<27x8xbf16, #tpu.memory_space<vmem>>, vector<3x8xbf16>
    %cst_5 = arith.constant dense<0.000000e+00> : vector<256x8xf32>
    %6 = tpu.matmul %4, %5, %cst_5 {dimension_numbers = #tpu.dot_dimension_numbers<[1], [0], [0], [1], [0, 0, 1, 1], [], []>} : vector<256x3xbf16>, vector<3x8xbf16>, vector<256x8xf32> -> vector<256x8xf32>
    %7 = arith.addf %2, %6 : vector<256x8xf32>
    %8 = vector.extract_strided_slice %1 {offsets = [0, 1, 0], sizes = [16, 16, 3], strides = [1, 1, 1]} : vector<18x18x3xbf16> to vector<16x16x3xbf16>
    %9 = vector.shape_cast %8 : vector<16x16x3xbf16> to vector<256x3xbf16>
    %c3 = arith.constant 3 : index
    %c0_6 = arith.constant 0 : index
    %10 = vector.load %arg2[%c3, %c0_6] : memref<27x8xbf16, #tpu.memory_space<vmem>>, vector<3x8xbf16>
    %cst_7 = arith.constant dense<0.000000e+00> : vector<256x8xf32>
    %11 = tpu.matmul %9, %10, %cst_7 {dimension_numbers = #tpu.dot_dimension_numbers<[1], [0], [0], [1], [0, 0, 1, 1], [], []>} : vector<256x3xbf16>, vector<3x8xbf16>, vector<256x8xf32> -> vector<256x8xf32>
    %12 = arith.addf %7, %11 : vector<256x8xf32>
    %13 = vector.extract_strided_slice %1 {offsets = [0, 2, 0], sizes = [16, 16, 3], strides = [1, 1, 1]} : vector<18x18x3xbf16> to vector<16x16x3xbf16>
    %14 = vector.shape_cast %13 : vector<16x16x3xbf16> to vector<256x3xbf16>
    %c6 = arith.constant 6 : index
    %c0_8 = arith.constant 0 : index
    %15 = vector.load %arg2[%c6, %c0_8] : memref<27x8xbf16, #tpu.memory_space<vmem>>, vector<3x8xbf16>
    %cst_9 = arith.constant dense<0.000000e+00> : vector<256x8xf32>
    %16 = tpu.matmul %14, %15, %cst_9 {dimension_numbers = #tpu.dot_dimension_numbers<[1], [0], [0], [1], [0, 0, 1, 1], [], []>} : vector<256x3xbf16>, vector<3x8xbf16>, vector<256x8xf32> -> vector<256x8xf32>
    %17 = arith.addf %12, %16 : vector<256x8xf32>
    %18 = vector.extract_strided_slice %1 {offsets = [1, 0, 0], sizes = [16, 16, 3], strides = [1, 1, 1]} : vector<18x18x3xbf16> to vector<16x16x3xbf16>
    %19 = vector.shape_cast %18 : vector<16x16x3xbf16> to vector<256x3xbf16>
    %c9 = arith.constant 9 : index
    %c0_10 = arith.constant 0 : index
    %20 = vector.load %arg2[%c9, %c0_10] : memref<27x8xbf16, #tpu.memory_space<vmem>>, vector<3x8xbf16>
    %cst_11 = arith.constant dense<0.000000e+00> : vector<256x8xf32>
    %21 = tpu.matmul %19, %20, %cst_11 {dimension_numbers = #tpu.dot_dimension_numbers<[1], [0], [0], [1], [0, 0, 1, 1], [], []>} : vector<256x3xbf16>, vector<3x8xbf16>, vector<256x8xf32> -> vector<256x8xf32>
    %22 = arith.addf %17, %21 : vector<256x8xf32>
    %23 = vector.extract_strided_slice %1 {offsets = [1, 1, 0], sizes = [16, 16, 3], strides = [1, 1, 1]} : vector<18x18x3xbf16> to vector<16x16x3xbf16>
    %24 = vector.shape_cast %23 : vector<16x16x3xbf16> to vector<256x3xbf16>
    %c12 = arith.constant 12 : index
    %c0_12 = arith.constant 0 : index
    %25 = vector.load %arg2[%c12, %c0_12] : memref<27x8xbf16, #tpu.memory_space<vmem>>, vector<3x8xbf16>
    %cst_13 = arith.constant dense<0.000000e+00> : vector<256x8xf32>
    %26 = tpu.matmul %24, %25, %cst_13 {dimension_numbers = #tpu.dot_dimension_numbers<[1], [0], [0], [1], [0, 0, 1, 1], [], []>} : vector<256x3xbf16>, vector<3x8xbf16>, vector<256x8xf32> -> vector<256x8xf32>
    %27 = arith.addf %22, %26 : vector<256x8xf32>
    %28 = vector.extract_strided_slice %1 {offsets = [1, 2, 0], sizes = [16, 16, 3], strides = [1, 1, 1]} : vector<18x18x3xbf16> to vector<16x16x3xbf16>
    %29 = vector.shape_cast %28 : vector<16x16x3xbf16> to vector<256x3xbf16>
    %c15 = arith.constant 15 : index
    %c0_14 = arith.constant 0 : index
    %30 = vector.load %arg2[%c15, %c0_14] : memref<27x8xbf16, #tpu.memory_space<vmem>>, vector<3x8xbf16>
    %cst_15 = arith.constant dense<0.000000e+00> : vector<256x8xf32>
    %31 = tpu.matmul %29, %30, %cst_15 {dimension_numbers = #tpu.dot_dimension_numbers<[1], [0], [0], [1], [0, 0, 1, 1], [], []>} : vector<256x3xbf16>, vector<3x8xbf16>, vector<256x8xf32> -> vector<256x8xf32>
    %32 = arith.addf %27, %31 : vector<256x8xf32>
    %33 = vector.extract_strided_slice %1 {offsets = [2, 0, 0], sizes = [16, 16, 3], strides = [1, 1, 1]} : vector<18x18x3xbf16> to vector<16x16x3xbf16>
    %34 = vector.shape_cast %33 : vector<16x16x3xbf16> to vector<256x3xbf16>
    %c18 = arith.constant 18 : index
    %c0_16 = arith.constant 0 : index
    %35 = vector.load %arg2[%c18, %c0_16] : memref<27x8xbf16, #tpu.memory_space<vmem>>, vector<3x8xbf16>
    %cst_17 = arith.constant dense<0.000000e+00> : vector<256x8xf32>
    %36 = tpu.matmul %34, %35, %cst_17 {dimension_numbers = #tpu.dot_dimension_numbers<[1], [0], [0], [1], [0, 0, 1, 1], [], []>} : vector<256x3xbf16>, vector<3x8xbf16>, vector<256x8xf32> -> vector<256x8xf32>
    %37 = arith.addf %32, %36 : vector<256x8xf32>
    %38 = vector.extract_strided_slice %1 {offsets = [2, 1, 0], sizes = [16, 16, 3], strides = [1, 1, 1]} : vector<18x18x3xbf16> to vector<16x16x3xbf16>
    %39 = vector.shape_cast %38 : vector<16x16x3xbf16> to vector<256x3xbf16>
    %c21 = arith.constant 21 : index
    %c0_18 = arith.constant 0 : index
    %40 = vector.load %arg2[%c21, %c0_18] : memref<27x8xbf16, #tpu.memory_space<vmem>>, vector<3x8xbf16>
    %cst_19 = arith.constant dense<0.000000e+00> : vector<256x8xf32>
    %41 = tpu.matmul %39, %40, %cst_19 {dimension_numbers = #tpu.dot_dimension_numbers<[1], [0], [0], [1], [0, 0, 1, 1], [], []>} : vector<256x3xbf16>, vector<3x8xbf16>, vector<256x8xf32> -> vector<256x8xf32>
    %42 = arith.addf %37, %41 : vector<256x8xf32>
    %43 = vector.extract_strided_slice %1 {offsets = [2, 2, 0], sizes = [16, 16, 3], strides = [1, 1, 1]} : vector<18x18x3xbf16> to vector<16x16x3xbf16>
    %44 = vector.shape_cast %43 : vector<16x16x3xbf16> to vector<256x3xbf16>
    %c24 = arith.constant 24 : index
    %c0_20 = arith.constant 0 : index
    %45 = vector.load %arg2[%c24, %c0_20] : memref<27x8xbf16, #tpu.memory_space<vmem>>, vector<3x8xbf16>
    %cst_21 = arith.constant dense<0.000000e+00> : vector<256x8xf32>
    %46 = tpu.matmul %44, %45, %cst_21 {dimension_numbers = #tpu.dot_dimension_numbers<[1], [0], [0], [1], [0, 0, 1, 1], [], []>} : vector<256x3xbf16>, vector<3x8xbf16>, vector<256x8xf32> -> vector<256x8xf32>
    %47 = arith.addf %42, %46 : vector<256x8xf32>
    %c0_22 = arith.constant 0 : index
    %c0_23 = arith.constant 0 : index
    %48 = vector.load %arg3[%c0_22, %c0_23] : memref<1x8xf32, #tpu.memory_space<vmem>>, vector<1x8xf32>
    %49 = vector.broadcast %48 : vector<1x8xf32> to vector<256x8xf32>
    %50 = arith.addf %47, %49 : vector<256x8xf32>
    %51 = vector.shape_cast %50 : vector<256x8xf32> to vector<16x16x8xf32>
    %52 = arith.truncf %51 : vector<16x16x8xf32> to vector<16x16x8xbf16>
    %c0_24 = arith.constant 0 : index
    %c0_25 = arith.constant 0 : index
    %c0_26 = arith.constant 0 : index
    %c0_27 = arith.constant 0 : index
    %53 = vector.load %arg4[%c0_24, %c0_25, %c0_26, %c0_27] : memref<1x16x16x8xbf16, #tpu.memory_space<vmem>>, vector<1x16x16x8xbf16>
    %54 = vector.shape_cast %53 : vector<1x16x16x8xbf16> to vector<16x16x8xbf16>
    %55 = vector.shape_cast %52 : vector<16x16x8xbf16> to vector<1x16x16x8xbf16>
    tpu.vector_store %arg4[%c0_24, %c0_25, %c0_26, %c0_27], %55 {strides = array<i32>} : memref<1x16x16x8xbf16, #tpu.memory_space<vmem>>, vector<1x16x16x8xbf16>,
    return
  }
  func.func @transform_0(%arg0: i32) -> (i32, i32, i32, i32) {
    %c0_i32 = arith.constant 0 : i32
    %c0_i32_0 = arith.constant 0 : i32
    %c0_i32_1 = arith.constant 0 : i32
    %c0_i32_2 = arith.constant 0 : i32
    return %arg0, %c0_i32, %c0_i32_0, %c0_i32_1 : i32, i32, i32, i32
  }
  func.func @transform_1(%arg0: i32) -> (i32, i32) {
    %c0_i32 = arith.constant 0 : i32
    %c0_i32_0 = arith.constant 0 : i32
    %c0_i32_1 = arith.constant 0 : i32
    return %c0_i32, %c0_i32_0 : i32, i32
  }
  func.func @transform_2(%arg0: i32) -> (i32, i32) {
    %c0_i32 = arith.constant 0 : i32
    %c0_i32_0 = arith.constant 0 : i32
    %c0_i32_1 = arith.constant 0 : i32
    return %c0_i32, %c0_i32_0 : i32, i32
  }
  func.func @transform_3(%arg0: i32) -> (i32, i32, i32, i32) {
    %c0_i32 = arith.constant 0 : i32
    %c0_i32_0 = arith.constant 0 : i32
    %c0_i32_1 = arith.constant 0 : i32
    %c0_i32_2 = arith.constant 0 : i32
    return %arg0, %c0_i32, %c0_i32_0, %c0_i32_1 : i32, i32, i32, i32
  }
}

</mosaic_0001>

<bundles_post_ra>
// kernel: _conv3_call.1
= control target key start
LH: loop header
LB: loop body
LE: loop exit
PB: predicated region body
PF: predicated region fallthrough
CT: control target
= control target key end

     0   :  { %s2776_s12 = smov 0   ;;  %s3958_s0 = inlined_call_operand.vmem [shape: bf16[2,18,18,3], index: 0, kind: input, shape index: {}]   ;;  %s3959_s1 = inlined_call_operand.vmem [shape: bf16[27,8], index: 1, kind: input, shape index: {}]   ;;  %s3960_s2 = inlined_call_operand.vmem [shape: f32[1,8], index: 2, kind: input, shape index: {}]   ;;  %s3961_s3 = inlined_call_operand.vmem [shape: bf16[2,16,16,8], index: 3, kind: output, shape index: {}]  }
   0x1 LB: > { %s2451_s13 = sadd.s32 4294967295, %s2753_s12   ;;  %p2455_p0 = scmp.ge.s32.totalorder %s2753_s12, 1  ;;  %s2753_s12 = sphi %s2776_s12, %s13_s12  }
   0x2   : > { %p137_p1 = scmp.lt.s32.totalorder %s2753_s12, 3 }
   0x4   : > { %p138_p2 = pnand %p2455_p0, %p137_p1 }
   0x6   : > { %141 = sbr.rel (%p138_p2) target bundleno = 760 (0x2f8), region = 32 }
   0xb   : > { %v614_v0 = vld [vmem:[%s3959_s1] sm:$0x6]  ;;  %vm723_vm0 = vcmask 1040384   ;;  %p161_p3 = scmp.lt.s32.totalorder %s2451_s13, 1  ;;  %v2573_v2 = vld [vmem:[%s3959_s1] sm:$0x8] }
   0xc   : > { %v664_v1 = vunpack.c.l.b16 %v614_v0  ;;  %vm724_vm1 = vcmask 1041408   ;;  %v2755_v4 = vmov 65535   ;;  %v2722_v6 = vld [vmem:[%s3959_s1] sm:$0x10]  ;;  %v226_v9 = vld [vmem:[%s3959_s1] sm:$0x3] }
   0xd   : > { %s4111_s13 = smov (!%p161_p3, %s2451_s13), 1  ;;  %v725_v5 = vsel %vm723_vm0, 4294967295, %v2755_v4  ;;  %v1398_v7 = vld [vmem:[%s3959_s1 + $0x4] sm:$0x3]  ;;  %v2574_v8 = vor.u32 %v2722_v6, %v2573_v2  ;;  %vm227_vm2 = vsmask.f32 3328 }
   0xe   : > { %v665_v3 = vpack.c.b16 %v664_v1, %v664_v1  ;;  %s2727_s22 = smul.u32 216, %s4111_s13  ;;  %v2802_v12 = vsel %vm724_vm1, %v725_v5, 0  ;;  %vm228_vm3 = vsmask.f32 7440  ;;  %v2812_v14 = vld [vmem:[%s3959_s1 + $0x4] sm:$0xc]  ;;  %v1405_v19 = vunpack.c.l.b16 %v1398_v7 }
   0xf   : > { %v1225_v13 = vrot.slane %v2574_v8, 3  ;;  %v948_v20 = vand.u32 %v2802_v12, %v226_v9  ;;  %v1570_v31 = vunpack.c.l.b16 %v2812_v14  ;;  %vm674_vm4 = vcmask 23552   ;;  %vm2838_vm5 = vmor %vm227_vm2, %vm228_vm3  ;;  %s2703_s17 = sshll.u32 %s4111_s13, 7 }
  0x10   : > { %v667_v10 = vshrl.u32 %v665_v3, 16  ;;  %v670_v11 = vshll.u32 %v665_v3, 16  ;;  %s2807_s27 = scalar_lea.vmem %s3958_s0, %s2727_s22  ;;  %v2843_v51 = vpack.c.b16 %v1405_v19, %v1405_v19  ;;  %vm1055_vm6 = vcmask 1042432   ;;  %s3750_s20 = scalar_lea.vmem %s3961_s3, %s2703_s17 }
  0x11   : > { %v2815_v17 = vld [vmem:[%s2807_s27 + $0x30] sm:$0xf]  ;;  %v2818_v18 = vld [vmem:[%s2807_s27 + $0x34] sm:$0xf]  ;;  %v2822_v21 = vld [vmem:[%s2807_s27 + $0x38] sm:$0x1]  ;;  %v1275_v30 = vand.u32 %v1225_v13, %v2802_v12 }
  0x12   : > { %v669_v15 = vrot.slane %v667_v10, 1  ;;  %v672_v16 = vrot.slane %v670_v11, 2  ;;  %v327_v22 = vshrl.u32 %v2815_v17, 16  ;;  %v330_v23 = vshll.u32 %v2815_v17, 16  ;;  %v196_v28 = vld [vmem:[%s2807_s27 + $0x60] sm:$0xf] }
  0x13   : > { %v336_v24 = vshll.u32 %v2818_v18, 16  ;;  %v340_v25 = vshrl.u32 %v2818_v18, 16  ;;  %v346_v27 = vshll.u32 %v2822_v21, 16  ;;  %v197_v29 = vld [vmem:[%s2807_s27 + $0x64] sm:$0xf]  ;;  %v423_v39 = vshrl.u32 %v196_v28, 16 }
  0x14   : > { %v673_v26 = vor.u32 %v672_v16, %v669_v15  ;;  %v329_v32 = vrot.slane %v327_v22, 4  ;;  %v332_v33 = vrot.slane %v330_v23, 5  ;;  %v198_v36 = vld [vmem:[%s2807_s27 + $0x68] sm:$0x1]  ;;  %v426_v40 = vshll.u32 %v196_v28, 16 }
  0x15   : > { %v338_v34 = vrot.slane %v336_v24, 5  ;;  %v342_v35 = vrot.slane %v340_v25, 4  ;;  %v348_v38 = vrot.slane %v346_v27, 5  ;;  %v432_v43 = vshll.u32 %v197_v29, 16  ;;  %v208_v45 = vld [vmem:[%s2807_s27 + $0x90] sm:$0xf] }
  0x16   : > { %v728_v37 = vand.u32 %v2802_v12, %v673_v26  ;;  %v333_v41 = vor.u32 %v332_v33, %v329_v32  ;;  %v436_v44 = vshrl.u32 %v197_v29, 16  ;;  %v425_v47 = vrot.slane %v423_v39, 4  ;;  %v209_v50 = vld [vmem:[%s2807_s27 + $0x94] sm:$0xf]  ;;  %v210_v63 = vld [vmem:[%s2807_s27 + $0x98] sm:$0x1] }
  0x17   : > { %v343_v42 = vor.u32 %v342_v35, %v338_v34  ;;  %v428_v48 = vrot.slane %v426_v40, 5  ;;  %v442_v49 = vshll.u32 %v198_v36, 16  ;;  %v434_v54 = vrot.slane %v432_v43, 5  ;;  %v2851_v9 = vld [vmem:[%s2807_s27] sm:$0xf] }
  0x18   : > { %2724 = vmatpush.bf16.msra.mxu1 %v728_v37  ;;  %2725 = vmatpush.bf16.msra.mxu2 %v728_v37  ;;  %v334_v52 = vrot.slane %v333_v41, 4  ;;  %v438_v55 = vrot.slane %v436_v44, 4  ;;  %v519_v58 = vshrl.u32 %v208_v45, 16  ;;  %v522_v59 = vshll.u32 %v208_v45, 16  ;;  %v2858_v14 = vld [vmem:[%s2807_s27 + $0x4] sm:$0xf] }
  0x19   : > { %2726 = vmatpush.bf16.msra.mxu3 %v728_v37  ;;  %737 = vmatpush.bf16.msra.mxu0 %v728_v37  ;;  %v344_v53 = vrot.slane %v343_v42, 4  ;;  %v429_v56 = vor.u32 %v428_v48, %v425_v47  ;;  %v444_v57 = vrot.slane %v442_v49, 5  ;;  %v528_v0 = vshll.u32 %v209_v50, 16  ;;  %v2863_v23 = vld [vmem:[%s2807_s27 + $0x8] sm:$0x1] }
  0x1a   : > { %v339_v60 = vsel %vm2838_vm5, %v334_v52, %v338_v34  ;;  %v439_v62 = vor.u32 %v438_v55, %v434_v54  ;;  %v521_v4 = vrot.slane %v519_v58, 4  ;;  %v524_v6 = vrot.slane %v522_v59, 5  ;;  %v2877_v40 = vld [vmem:[%s2807_s27 + $0x3c] sm:$0xf]  ;;  %v2883_v45 = vld [vmem:[%s2807_s27 + $0x40] sm:$0xf] }
  0x1b   : > { %v349_v61 = vsel %vm2838_vm5, %v344_v53, %v348_v38  ;;  %v623_v1 = vunpack.c.l.b16 %v339_v60  ;;  %v430_v3 = vrot.slane %v429_v56, 4  ;;  %v530_v7 = vrot.slane %v528_v0, 5  ;;  %v2892_v59 = vld [vmem:[%s2807_s27 + $0x44] sm:$0x1]  ;;  %v2900_v0 = vld [vmem:[%s2807_s27 + $0x6c] sm:$0xf] }
  0x1c   : > { %1284 = vmatpush.bf16.msrb.mxu2 %v1275_v30  ;;  %957 = vmatpush.bf16.msrb.mxu1 %v948_v20  ;;  %v624_v2 = vunpack.c.l.b16 %v349_v61  ;;  %v440_v5 = vrot.slane %v439_v62, 4  ;;  %v532_v8 = vshrl.u32 %v209_v50, 16  ;;  %v538_v13 = vshll.u32 %v210_v63, 16 }
  0x1d   : > { %v435_v11 = vsel %vm2838_vm5, %v430_v3, %v434_v54  ;;  %v1571_v15 = vpack.c.b16 %v1570_v31, %v1570_v31  ;;  %v525_v20 = vor.u32 %v524_v6, %v521_v4  ;;  %v231_v26 = vshrl.u32 %v2851_v9, 16 }
  0x1e   : > { %v2853_v10 = vpack.c.b16 %v624_v2, %v623_v1  ;;  %v445_v16 = vsel %vm2838_vm5, %v440_v5, %v444_v57  ;;  %v631_v19 = vunpack.c.l.b16 %v435_v11  ;;  %v534_v22 = vrot.slane %v532_v8, 4  ;;  %v2903_v1 = vld [vmem:[%s2807_s27 + $0x70] sm:$0xf] }
  0x1f   : > { %v632_v24 = vunpack.c.l.b16 %v445_v16  ;;  %v540_v25 = vrot.slane %v538_v13, 5  ;;  %v234_v27 = vshll.u32 %v2851_v9, 16  ;;  %v526_v28 = vrot.slane %v525_v20, 4 }
  0x20   : > { %2463 = vmatmul.msk.bf16.vlgmr.msra.gmra.mxu1 %vm674_vm4, %v2853_v10  ;;  %v535_v29 = vor.u32 %v534_v22, %v530_v7  ;;  %v240_v30 = vshll.u32 %v2858_v14, 16  ;;  %v244_v31 = vshrl.u32 %v2858_v14, 16  ;;  %v233_v33 = vrot.slane %v231_v26, 4  ;;  %v211_v26 = vld [vmem:[%s2807_s27 + $0x9c] sm:$0xf] }
  0x21   : > { %v2871_v32 = vpack.c.b16 %v632_v24, %v631_v19  ;;  %v236_v34 = vrot.slane %v234_v27, 5  ;;  %v250_v35 = vshll.u32 %v2863_v23, 16  ;;  %v531_v36 = vsel %vm2838_vm5, %v526_v28, %v530_v7 }
  0x22   : > { %v536_v37 = vrot.slane %v535_v29, 4  ;;  %v242_v38 = vrot.slane %v240_v30, 5  ;;  %v246_v39 = vrot.slane %v244_v31, 4  ;;  %v639_v41 = vunpack.c.l.b16 %v531_v36  ;;  %v212_v31 = vld [vmem:[%s2807_s27 + $0xa0] sm:$0xf] }
  0x23   : > { %4006 = vst [vmem:[#allocation2_spill] sm:$0xff] %v2871_v32  ;;  %2467 = vmatmul.msk.bf16.vlgmr.msra.gmra.mxu2 %vm674_vm4, %v2871_v32  ;;  %v237_v42 = vor.u32 %v236_v34, %v233_v33  ;;  %v252_v43 = vrot.slane %v250_v35, 5  ;;  %v1408_v44 = vshrl.u32 %v2843_v51, 16  ;;  %v1410_v49 = vshll.u32 %v2843_v51, 16 }
  0x24   : > { %v541_v47 = vsel %vm2838_vm5, %v536_v37, %v540_v25  ;;  %v247_v48 = vor.u32 %v246_v39, %v242_v38  ;;  %v1572_v50 = vrot.slane %v1571_v15, 2  ;;  %v351_v54 = vshrl.u32 %v2877_v40, 16  ;;  %v2913_v15 = vld [vmem:[%s2807_s27 + $0x74] sm:$0x1] }
  0x25   : > { %v640_v52 = vunpack.c.l.b16 %v541_v47  ;;  %v238_v53 = vrot.slane %v237_v42, 4  ;;  %v354_v55 = vshll.u32 %v2877_v40, 16  ;;  %v1412_v57 = vrot.slane %v1410_v49, 1 }
  0x26   : > { %v248_v56 = vrot.slane %v247_v48, 4  ;;  %v1577_v58 = vand.u32 %v1572_v50, %v2802_v12  ;;  %v360_v60 = vshll.u32 %v2883_v45, 16  ;;  %v353_v62 = vrot.slane %v351_v54, 4 }
  0x27   : > { %v2895_v61 = vpack.c.b16 %v640_v52, %v639_v41  ;;  %v243_v51 = vsel %vm2838_vm5, %v238_v53, %v242_v38  ;;  %v356_v63 = vrot.slane %v354_v55, 5  ;;  %v1413_v4 = vor.u32 %v1412_v57, %v1408_v44  ;;  %v213_v41 = vld [vmem:[%s2807_s27 + $0xa4] sm:$0x1] }
  0x28   : > { %v253_v2 = vsel %vm2838_vm5, %v248_v56, %v252_v43  ;;  %v615_v3 = vunpack.c.l.b16 %v243_v51  ;;  %1586 = vmatpush.bf16.msrb.mxu0 %v1577_v58  ;;  %v362_v5 = vrot.slane %v360_v60, 5  ;;  %v364_v8 = vshrl.u32 %v2883_v45, 16  ;;  %v2929_v58 = vld [vmem:[%s2807_s27 + $0xc] sm:$0xf] }
  0x29   : > { %4007 = vst [vmem:[#allocation3_spill] sm:$0xff] %v2895_v61  ;;  %2471 = vmatmul.msk.bf16.vlgmr.msra.gmra.mxu3 %vm674_vm4, %v2895_v61  ;;  %v616_v6 = vunpack.c.l.b16 %v253_v2  ;;  %v357_v7 = vor.u32 %v356_v63, %v353_v62  ;;  %v370_v11 = vshll.u32 %v2892_v59, 16  ;;  %v1418_v13 = vand.u32 %v1413_v4, %v2802_v12  ;;  %v2934_v2 = vld [vmem:[%s2807_s27 + $0x10] sm:$0xf] }
  0x2a   : > { %v447_v16 = vshrl.u32 %v2900_v0, 16  ;;  %v450_v19 = vshll.u32 %v2900_v0, 16  ;;  %v456_v20 = vshll.u32 %v2903_v1, 16  ;;  %v366_v25 = vrot.slane %v364_v8, 4 }
  0x2b   : > { %v647_v22 = vpack.c.b16 %v616_v6, %v615_v3  ;;  %v358_v24 = vrot.slane %v357_v7, 4  ;;  %1427 = vmatpush.bf16.msrb.mxu3 %v1418_v13  ;;  %v460_v30 = vshrl.u32 %v2903_v1, 16  ;;  %v372_v35 = vrot.slane %v370_v11, 5  ;;  %v2937_v6 = vld [vmem:[%s2807_s27 + $0x14] sm:$0x1] }
  0x2c   : > { %v449_v27 = vrot.slane %v447_v16, 4  ;;  %v452_v28 = vrot.slane %v450_v19, 5  ;;  %v458_v29 = vrot.slane %v456_v20, 5  ;;  %v367_v34 = vor.u32 %v366_v25, %v362_v5 }
  0x2d   : > { %2459 = vmatmul.msk.bf16.vlgmr.msra.gmra.mxu0 %vm674_vm4, %v647_v22  ;;  %v363_v33 = vsel %vm2838_vm5, %v358_v24, %v362_v5  ;;  %v466_v36 = vshll.u32 %v2913_v15, 16  ;;  %v462_v39 = vrot.slane %v460_v30, 4  ;;  %v543_v42 = vshrl.u32 %v211_v26, 16 }
  0x2e   : > { %v625_v37 = vunpack.c.l.b16 %v363_v33  ;;  %v453_v38 = vor.u32 %v452_v28, %v449_v27  ;;  %v368_v43 = vrot.slane %v367_v34, 4  ;;  %v546_v47 = vshll.u32 %v211_v26, 16  ;;  %v2951_v28 = vld [vmem:[%s2807_s27 + $0x48] sm:$0xf]  ;;  %v2958_v34 = vld [vmem:[%s2807_s27 + $0x4c] sm:$0xf] }
  0x2f   : > { %v468_v44 = vrot.slane %v466_v36, 5  ;;  %v552_v48 = vshll.u32 %v212_v31, 16  ;;  %v463_v50 = vor.u32 %v462_v39, %v458_v29  ;;  %v545_v52 = vrot.slane %v543_v42, 4 }
  0x30   : > { %v454_v49 = vrot.slane %v453_v38, 4  ;;  %v556_v53 = vshrl.u32 %v212_v31, 16  ;;  %v373_v54 = vsel %vm2838_vm5, %v368_v43, %v372_v35  ;;  %v548_v55 = vrot.slane %v546_v47, 5  ;;  %v2961_v35 = vld [vmem:[%s2807_s27 + $0x50] sm:$0x1] }
  0x31   : > { %v554_v56 = vrot.slane %v552_v48, 5  ;;  %v562_v57 = vshll.u32 %v213_v41, 16  ;;  %v626_v60 = vunpack.c.l.b16 %v373_v54  ;;  %v464_v62 = vrot.slane %v463_v50, 4 }
  0x32   : > { %v459_v51 = vsel %vm2838_vm5, %v454_v49, %v458_v29  ;;  %v558_v63 = vrot.slane %v556_v53, 4  ;;  %v549_v4 = vor.u32 %v548_v55, %v545_v52  ;;  %v255_v13 = vshrl.u32 %v2929_v58, 16  ;;  %v2973_v52 = vld [vmem:[%s2807_s27 + $0x78] sm:$0xf] }
  0x33   : > { %v633_v3 = vunpack.c.l.b16 %v459_v51  ;;  %v564_v5 = vrot.slane %v562_v57, 5  ;;  %v2939_v7 = vpack.c.b16 %v626_v60, %v625_v37  ;;  %v469_v8 = vsel %vm2838_vm5, %v464_v62, %v468_v44  ;;  %4008 = vst [vmem:[#allocation4_spill] sm:$0xff] %v2973_v52  ;;  %v2978_v57 = vld [vmem:[%s2807_s27 + $0x7c] sm:$0xf] }
  0x34   : > { %v559_v11 = vor.u32 %v558_v63, %v554_v56  ;;  %v634_v16 = vunpack.c.l.b16 %v469_v8  ;;  %v550_v19 = vrot.slane %v549_v4, 4  ;;  %v258_v20 = vshll.u32 %v2929_v58, 16 }
  0x35   : > { %v264_v22 = vshll.u32 %v2934_v2, 16  ;;  %2464 = vmatmul.msk.bf16.gmra.mxu1 %vm674_vm4, %v2939_v7  ;;  %v257_v25 = vrot.slane %v255_v13, 4  ;;  %v268_v26 = vshrl.u32 %v2934_v2, 16  ;;  %v274_v27 = vshll.u32 %v2937_v6, 16 }
  0x36   : > { %v560_v24 = vrot.slane %v559_v11, 4  ;;  %v2953_v29 = vpack.c.b16 %v634_v16, %v633_v3  ;;  %v555_v30 = vsel %vm2838_vm5, %v550_v19, %v554_v56  ;;  %v260_v31 = vrot.slane %v258_v20, 5 }
  0x37   : > { %v266_v33 = vrot.slane %v264_v22, 5  ;;  %v641_v37 = vunpack.c.l.b16 %v555_v30  ;;  %v270_v38 = vrot.slane %v268_v26, 4  ;;  %v276_v39 = vrot.slane %v274_v27, 5 }
  0x38   : > { %v565_v36 = vsel %vm2838_vm5, %v560_v24, %v564_v5  ;;  %2468 = vmatmul.msk.bf16.gmra.mxu2 %vm674_vm4, %v2953_v29  ;;  %v261_v42 = vor.u32 %v260_v31, %v257_v25  ;;  %v375_v43 = vshrl.u32 %v2951_v28, 16  ;;  %v378_v44 = vshll.u32 %v2951_v28, 16  ;;  %v2985_v5 = vld [vmem:[%s2807_s27 + $0x80] sm:$0x1] }
  0x39   : > { %v642_v41 = vunpack.c.l.b16 %v565_v36  ;;  %v271_v47 = vor.u32 %v270_v38, %v266_v33  ;;  %v384_v48 = vshll.u32 %v2958_v34, 16  ;;  %v388_v49 = vshrl.u32 %v2958_v34, 16  ;;  %v2995_v36 = vld [vmem:[%s2807_s27 + $0xa8] sm:$0xf] }
  0x3a   : > { %v394_v50 = vshll.u32 %v2961_v35, 16  ;;  %v262_v54 = vrot.slane %v261_v42, 4  ;;  %v377_v55 = vrot.slane %v375_v43, 4  ;;  %v380_v56 = vrot.slane %v378_v44, 5  ;;  %4010 = vst [vmem:[#allocation6_spill] sm:$0xff] %v2995_v36 }
  0x3b   : > { %v2975_v53 = vpack.c.b16 %v642_v41, %v641_v37  ;;  %v272_v60 = vrot.slane %v271_v47, 4  ;;  %v386_v51 = vrot.slane %v384_v48, 5  ;;  %v390_v62 = vrot.slane %v388_v49, 4  ;;  %v3002_v41 = vld [vmem:[%s2807_s27 + $0xac] sm:$0xf] }
  0x3c   : > { %v396_v63 = vrot.slane %v394_v50, 5  ;;  %v267_v3 = vsel %vm2838_vm5, %v262_v54, %v266_v33  ;;  %v381_v4 = vor.u32 %v380_v56, %v377_v55  ;;  %v471_v8 = vshrl.u32 %v2973_v52, 16  ;;  %4011 = vst [vmem:[#allocation7_spill] sm:$0xff] %v3002_v41  ;;  %v3005_v42 = vld [vmem:[%s2807_s27 + $0xb0] sm:$0x1] }
  0x3d   : > { %4009 = vst [vmem:[#allocation5_spill] sm:$0xff] %v2975_v53  ;;  %2472 = vmatmul.msk.bf16.gmra.mxu3 %vm674_vm4, %v2975_v53  ;;  %v474_v11 = vshll.u32 %v2973_v52, 16  ;;  %v277_v13 = vsel %vm2838_vm5, %v272_v60, %v276_v39  ;;  %v617_v16 = vunpack.c.l.b16 %v267_v3  ;;  %v391_v19 = vor.u32 %v390_v62, %v386_v51 }
  0x3e   : > { %v480_v20 = vshll.u32 %v2978_v57, 16  ;;  %v618_v22 = vunpack.c.l.b16 %v277_v13  ;;  %v382_v24 = vrot.slane %v381_v4, 4  ;;  %v473_v25 = vrot.slane %v471_v8, 4  ;;  %4012 = vst [vmem:[#allocation8_spill] sm:$0xff] %v3005_v42  ;;  %v3024_v13 = vld [vmem:[%s2807_s27 + $0x1c] sm:$0xf] }
  0x3f   : > { %v476_v26 = vrot.slane %v474_v11, 5  ;;  %v392_v27 = vrot.slane %v391_v19, 4  ;;  %v484_v31 = vshrl.u32 %v2978_v57, 16  ;;  %v490_v33 = vshll.u32 %v2985_v5, 16 }
  0x40   : > { %v482_v30 = vrot.slane %v480_v20, 5  ;;  %v2997_v37 = vpack.c.b16 %v618_v22, %v617_v16  ;;  %v387_v38 = vsel %vm2838_vm5, %v382_v24, %v386_v51  ;;  %v567_v54 = vshrl.u32 %v2995_v36, 16 }
  0x41   : > { %v477_v39 = vor.u32 %v476_v26, %v473_v25  ;;  %v397_v43 = vsel %vm2838_vm5, %v392_v27, %v396_v63  ;;  %v627_v44 = vunpack.c.l.b16 %v387_v38  ;;  %v486_v47 = vrot.slane %v484_v31, 4  ;;  %v3017_v63 = vld [vmem:[%s2807_s27 + $0x18] sm:$0xf]  ;;  %v3029_v26 = vld [vmem:[%s2807_s27 + $0x20] sm:$0x1] }
  0x42   : > { %v492_v48 = vrot.slane %v490_v33, 5  ;;  %2460 = vmatmul.msk.bf16.gmra.mxu0 %vm674_vm4, %v2997_v37  ;;  %v628_v49 = vunpack.c.l.b16 %v397_v43  ;;  %v570_v55 = vshll.u32 %v2995_v36, 16  ;;  %v576_v60 = vshll.u32 %v3002_v41, 16 }
  0x43   : > { %v478_v50 = vrot.slane %v477_v39, 4  ;;  %v487_v56 = vor.u32 %v486_v47, %v482_v30  ;;  %v580_v51 = vshrl.u32 %v3002_v41, 16  ;;  %v586_v62 = vshll.u32 %v3005_v42, 16  ;;  %v3037_v39 = vld [vmem:[%s2807_s27 + $0x54] sm:$0xf] }
  0x44   : > { %v3019_v3 = vpack.c.b16 %v628_v49, %v627_v44  ;;  %v569_v8 = vrot.slane %v567_v54, 4  ;;  %v572_v11 = vrot.slane %v570_v55, 5  ;;  %v578_v19 = vrot.slane %v576_v60, 5 }
  0x45   : > { %v483_v4 = vsel %vm2838_vm5, %v478_v50, %v482_v30  ;;  %v488_v16 = vrot.slane %v487_v56, 4  ;;  %v582_v20 = vrot.slane %v580_v51, 4  ;;  %v588_v25 = vrot.slane %v586_v62, 5  ;;  %v3046_v62 = vld [vmem:[%s2807_s27 + $0x58] sm:$0xf] }
  0x46   : > { %2465 = vmatmul.msk.bf16.gmra.mxu1 %vm674_vm4, %v3019_v3  ;;  %v635_v22 = vunpack.c.l.b16 %v483_v4  ;;  %v573_v24 = vor.u32 %v572_v11, %v569_v8  ;;  %v279_v27 = vshrl.u32 %v3017_v63, 16  ;;  %v282_v33 = vshll.u32 %v3017_v63, 16  ;;  %v3049_v4 = vld [vmem:[%s2807_s27 + $0x5c] sm:$0x1] }
  0x47   : > { %v493_v30 = vsel %vm2838_vm5, %v488_v16, %v492_v48  ;;  %v583_v31 = vor.u32 %v582_v20, %v578_v19  ;;  %v288_v38 = vshll.u32 %v3024_v13, 16  ;;  %v292_v49 = vshrl.u32 %v3024_v13, 16 }
  0x48   : > { %v636_v43 = vunpack.c.l.b16 %v493_v30  ;;  %v574_v44 = vrot.slane %v573_v24, 4  ;;  %v281_v47 = vrot.slane %v279_v27, 4  ;;  %v284_v54 = vrot.slane %v282_v33, 5  ;;  %v3055_v27 = vld [vmem:[%s2807_s27 + $0x84] sm:$0xf] }
  0x49   : > { %v584_v50 = vrot.slane %v583_v31, 4  ;;  %v290_v55 = vrot.slane %v288_v38, 5  ;;  %v298_v48 = vshll.u32 %v3029_v26, 16  ;;  %v294_v51 = vrot.slane %v292_v49, 4  ;;  %4014 = vst [vmem:[#allocation10_spill] sm:$0xff] %v3055_v27 }
  0x4a   : > { %v3041_v56 = vpack.c.b16 %v636_v43, %v635_v22  ;;  %v579_v60 = vsel %vm2838_vm5, %v574_v44, %v578_v19  ;;  %v399_v8 = vshrl.u32 %v3037_v39, 16  ;;  %v285_v20 = vor.u32 %v284_v54, %v281_v47 }
  0x4b   : > { %v589_v11 = vsel %vm2838_vm5, %v584_v50, %v588_v25  ;;  %v643_v16 = vunpack.c.l.b16 %v579_v60  ;;  %v300_v24 = vrot.slane %v298_v48, 5  ;;  %v295_v22 = vor.u32 %v294_v51, %v290_v55  ;;  %v3066_v50 = vld [vmem:[%s2807_s27 + $0x88] sm:$0xf] }
  0x4c   : > { %4013 = vst [vmem:[#allocation9_spill] sm:$0xff] %v3041_v56  ;;  %2469 = vmatmul.msk.bf16.gmra.mxu2 %vm674_vm4, %v3041_v56  ;;  %v644_v19 = vunpack.c.l.b16 %v589_v11  ;;  %v401_v30 = vrot.slane %v399_v8, 4  ;;  %v402_v31 = vshll.u32 %v3037_v39, 16  ;;  %v286_v33 = vrot.slane %v285_v20, 4  ;;  %v3072_v11 = vld [vmem:[%s2807_s27 + $0x8c] sm:$0x1] }
  0x4d   : > { %v408_v38 = vshll.u32 %v3046_v62, 16  ;;  %v412_v25 = vshrl.u32 %v3046_v62, 16  ;;  %v418_v43 = vshll.u32 %v3049_v4, 16  ;;  %v296_v47 = vrot.slane %v295_v22, 4  ;;  %4016 = vst [vmem:[#allocation12_spill] sm:$0xff] %v3066_v50 }
  0x4e   : > { %v3063_v44 = vpack.c.b16 %v644_v19, %v643_v16  ;;  %v404_v49 = vrot.slane %v402_v31, 5  ;;  %v495_v54 = vshrl.u32 %v3055_v27, 16  ;;  %v291_v48 = vsel %vm2838_vm5, %v286_v33, %v290_v55  ;;  %4017 = vst [vmem:[#allocation13_spill] sm:$0xff] %v3072_v11 }
  0x4f   : > { %v410_v60 = vrot.slane %v408_v38, 5  ;;  %v414_v51 = vrot.slane %v412_v25, 4  ;;  %v420_v8 = vrot.slane %v418_v43, 5  ;;  %v301_v16 = vsel %vm2838_vm5, %v296_v47, %v300_v24  ;;  %v3081_v38 = vld [vmem:[%s2807_s27 + $0xb4] sm:$0xf] }
  0x50   : > { %4015 = vst [vmem:[#allocation11_spill] sm:$0xff] %v3063_v44  ;;  %2473 = vmatmul.msk.bf16.gmra.mxu3 %vm674_vm4, %v3063_v44  ;;  %v619_v20 = vunpack.c.l.b16 %v291_v48  ;;  %v405_v19 = vor.u32 %v404_v49, %v401_v30  ;;  %v497_v22 = vrot.slane %v495_v54, 4  ;;  %v620_v31 = vunpack.c.l.b16 %v301_v16  ;;  %v3088_v49 = vld [vmem:[%s2807_s27 + $0xb8] sm:$0xf]  ;;  %v3093_v16 = vld [vmem:[%s2807_s27 + $0xbc] sm:$0x1] }
  0x51   : > { %v415_v36 = vor.u32 %v414_v51, %v410_v60  ;;  %v498_v55 = vshll.u32 %v3055_v27, 16  ;;  %v504_v33 = vshll.u32 %v3066_v50, 16  ;;  %4018 = vst [vmem:[#allocation14_spill] sm:$0xff] %v3081_v38  ;;  %v508_v43 = vshrl.u32 %v3066_v50, 16  ;;  %v3105_v27 = vld [vmem:[%s2807_s27 + $0x24] sm:$0xf] }
  0x52   : > { %v406_v25 = vrot.slane %v405_v19, 4  ;;  %v514_v44 = vshll.u32 %v3072_v11, 16  ;;  %v3085_v42 = vpack.c.b16 %v620_v31, %v619_v20  ;;  %4019 = vst [vmem:[#allocation15_spill] sm:$0xff] %v3088_v49  ;;  %v591_v19 = vshrl.u32 %v3081_v38, 16 }
  0x53   : > { %v416_v24 = vrot.slane %v415_v36, 4  ;;  %v500_v47 = vrot.slane %v498_v55, 5  ;;  %v506_v30 = vrot.slane %v504_v33, 5  ;;  %v510_v48 = vrot.slane %v508_v43, 4  ;;  %4020 = vst [vmem:[#allocation16_spill] sm:$0xff] %v3093_v16 }
  0x54   : > { %v411_v54 = vsel %vm2838_vm5, %v406_v25, %v410_v60  ;;  %v516_v51 = vrot.slane %v514_v44, 5  ;;  %2461 = vmatmul.msk.bf16.gmra.mxu0 %vm674_vm4, %v3085_v42  ;;  %v594_v55 = vshll.u32 %v3081_v38, 16  ;;  %v593_v25 = vrot.slane %v591_v19, 4 }
  0x55   : > { %v421_v36 = vsel %vm2838_vm5, %v416_v24, %v420_v8  ;;  %v629_v20 = vunpack.c.l.b16 %v411_v54  ;;  %v501_v31 = vor.u32 %v500_v47, %v497_v22  ;;  %v511_v60 = vor.u32 %v510_v48, %v506_v30  ;;  %v3111_v54 = vld [vmem:[%s2807_s27 + $0x28] sm:$0xf] }
  0x56   : > { %v630_v33 = vunpack.c.l.b16 %v421_v36  ;;  %v600_v44 = vshll.u32 %v3088_v49, 16  ;;  %v596_v41 = vrot.slane %v594_v55, 5  ;;  %v604_v53 = vshrl.u32 %v3088_v49, 16  ;;  %v3116_v55 = vld [vmem:[%s2807_s27 + $0x2c] sm:$0x1] }
  0x57   : > { %v502_v43 = vrot.slane %v501_v31, 4  ;;  %v610_v61 = vshll.u32 %v3093_v16, 16  ;;  %v512_v22 = vrot.slane %v511_v60, 4  ;;  %v306_v60 = vshll.u32 %v3105_v27, 16 }
  0x58   : > { %v3108_v24 = vpack.c.b16 %v630_v33, %v629_v20  ;;  %v602_v47 = vrot.slane %v600_v44, 5  ;;  %v597_v19 = vor.u32 %v596_v41, %v593_v25  ;;  %v606_v36 = vrot.slane %v604_v53, 4 }
  0x59   : > { %v507_v48 = vsel %vm2838_vm5, %v502_v43, %v506_v30  ;;  %v612_v31 = vrot.slane %v610_v61, 5  ;;  %v517_v8 = vsel %vm2838_vm5, %v512_v22, %v516_v51  ;;  %v303_v33 = vshrl.u32 %v3105_v27, 16  ;;  %v1853_v51 = vld [vmem:[%s3959_s1 + $0x8] sm:$0x6] }
  0x5a   : > { %4021 = vst [vmem:[#allocation17_spill] sm:$0xff] %v3108_v24  ;;  %2466 = vmatmul.msk.bf16.gmra.mxu1 %vm674_vm4, %v3108_v24  ;;  %v637_v20 = vunpack.c.l.b16 %v507_v48  ;;  %v638_v44 = vunpack.c.l.b16 %v517_v8  ;;  %v598_v38 = vrot.slane %v597_v19, 4  ;;  %v607_v16 = vor.u32 %v606_v36, %v602_v47  ;;  %v2014_v19 = vld [vmem:[%s3959_s1 + $0x8] sm:$0xc]  ;;  %v2630_v36 = vld [vmem:[%s3959_s1 + $0x4] sm:$0x8] }
  0x5b   : > { %v312_v41 = vshll.u32 %v3111_v54, 16  ;;  %v305_v53 = vrot.slane %v303_v33, 4  ;;  %v308_v61 = vrot.slane %v306_v60, 5  ;;  %v316_v30 = vshrl.u32 %v3111_v54, 16 }
  0x5c   : > { %v322_v25 = vshll.u32 %v3116_v55, 16  ;;  %v3130_v43 = vpack.c.b16 %v638_v44, %v637_v20  ;;  %v603_v22 = vsel %vm2838_vm5, %v598_v38, %v602_v47  ;;  %v608_v8 = vrot.slane %v607_v16, 4  ;;  %v2723_v20 = vld [vmem:[%s3959_s1 + $0x4] sm:$0x10]  ;;  %v2164_v38 = vld [vmem:[%s3959_s1 + $0xc] sm:$0x3] }
  0x5d   : > { %v314_v48 = vrot.slane %v312_v41, 5  ;;  %v645_v33 = vunpack.c.l.b16 %v603_v22  ;;  %v309_v60 = vor.u32 %v308_v61, %v305_v53  ;;  %v318_v49 = vrot.slane %v316_v30, 4 }
  0x5e   : > { %4022 = vst [vmem:[#allocation18_spill] sm:$0xff] %v3130_v43  ;;  %v324_v11 = vrot.slane %v322_v25, 5  ;;  %2470 = vmatmul.msk.bf16.gmra.mxu2 %vm674_vm4, %v3130_v43  ;;  %v613_v16 = vsel %vm2838_vm5, %v608_v8, %v612_v31  ;;  %vm1056_vm7 = vcmask 1046532   ;;  %v2555_v47 = vrot.slane %v2851_v9, 9 }
  0x5f   : > { %v646_v44 = vunpack.c.l.b16 %v613_v16  ;;  %v310_v41 = vrot.slane %v309_v60, 4  ;;  %v319_v53 = vor.u32 %v318_v49, %v314_v48  ;;  %vm3151_vm8 = vmor %vm1055_vm6, %vm1056_vm7  ;;  %v1060_v30 = vrot.slane %v2858_v14, 5 }
  0x60   : > { %v1860_v25 = vunpack.c.l.b16 %v1853_v51  ;;  %v2019_v22 = vunpack.c.l.b16 %v2014_v19  ;;  %v2631_v50 = vor.u32 %v2723_v20, %v2630_v36  ;;  %v2172_v43 = vand.u32 %v2164_v38, %v2802_v12 }
  0x61   : > { %v3157_v56 = vpack.c.b16 %v646_v44, %v645_v33  ;;  %v315_v31 = vsel %vm2838_vm5, %v310_v41, %v314_v48  ;;  %v320_v9 = vrot.slane %v319_v53, 4  ;;  %v1061_v49 = vsel %vm3151_vm8, %v2555_v47, %v1060_v30  ;;  %v2704_v44 = vld [vmem:[%s2807_s27] sm:$0xff] }
  0x62   : > { %v621_v8 = vunpack.c.l.b16 %v315_v31  ;;  %v1062_v60 = vrot.slane %v1060_v30, 4  ;;  %v1172_v16 = vunpack.c.l.b16 %v1061_v49  ;;  %v1861_v52 = vpack.c.b16 %v1860_v25, %v1860_v25  ;;  %2181 = vmatpush.bf16.msra.mxu0 %v2172_v43 }
  0x63   : > { %2474 = vmatmul.msk.bf16.gmra.mxu3 %vm674_vm4, %v3157_v56  ;;  %v325_v14 = vsel %vm2838_vm5, %v320_v9, %v324_v11  ;;  %v2020_v51 = vpack.c.b16 %v2019_v22, %v2019_v22  ;;  %v1719_v19 = vshrl.u32 %v2631_v50, 16  ;;  %v1722_v36 = vshll.u32 %v2631_v50, 16 }
  0x64   : > { %v622_v48 = vunpack.c.l.b16 %v325_v14  ;;  %v4025_v33 = vrot.slane %v2863_v23, 5  ;;  %v1862_v38 = vrot.slane %v1861_v52, 1  ;;  %v2556_v47 = vrot.slane %v2929_v58, 9 }
  0x65   : > { %v2022_v41 = vshrl.u32 %v2020_v51, 16  ;;  %v2025_v53 = vshll.u32 %v2020_v51, 16  ;;  %v1721_v30 = vrot.slane %v1719_v19, 3  ;;  %v1724_v22 = vrot.slane %v1722_v36, 4 }
  0x66   : > { %v1064_v20 = vsel %vm3151_vm8, %v1062_v60, %v4025_v33  ;;  %v3173_v25 = vpack.c.b16 %v622_v48, %v621_v8  ;;  %v1867_v11 = vand.u32 %v1862_v38, %v2802_v12  ;;  %v1067_v50 = vrot.slane %v2934_v2, 5  ;;  %v2705_v48 = vld [vmem:[%s2807_s27 + $0xc] sm:$0xff] }
  0x67   : > { %v1173_v43 = vunpack.c.l.b16 %v1064_v20  ;;  %v2024_v31 = vrot.slane %v2022_v41, 2  ;;  %v2027_v23 = vrot.slane %v2025_v53, 3  ;;  %v1070_v9 = vrot.slane %v2937_v6, 5 }
  0x68   : > { %2462 = vmatmul.msk.bf16.gmra.mxu0 %vm674_vm4, %v3173_v25  ;;  %1876 = vmatpush.bf16.msra.mxu2 %v1867_v11  ;;  %v1725_v58 = vor.u32 %v1724_v22, %v1721_v30  ;;  %v1068_v52 = vsel %vm3151_vm8, %v2556_v47, %v1067_v50  ;;  %v1069_v49 = vrot.slane %v1067_v50, 4  ;;  %v2557_v33 = vrot.slane %v3017_v63, 9 }
  0x69   : > { %v2028_v8 = vor.u32 %v2027_v23, %v2024_v31  ;;  %v1174_v60 = vunpack.c.l.b16 %v1068_v52  ;;  %v1204_v2 = vpack.c.b16 %v1173_v43, %v1172_v16  ;;  %v1074_v16 = vrot.slane %v3024_v13, 5  ;;  %v3219_v43 = vld [vmem:[%s2807_s27 + $0x24] sm:$0xff]  ;;  %v3241_v23 = vld [vmem:[%s2807_s27 + $0x30] sm:$0xff] }
  0x6a   : > { %2539 = vmatmul.msk.bf16.vlgmr.msrb.gmra.mxu1 %vm674_vm4, %v2704_v44  ;;  %v1730_v14 = vand.u32 %v1725_v58, %v2802_v12  ;;  %v1071_v6 = vsel %vm3151_vm8, %v1069_v49, %v1070_v9  ;;  %v1077_v38 = vrot.slane %v3029_v26, 5  ;;  %v1081_v26 = vrot.slane %v3111_v54, 5 }
  0x6b   : > { %v2033_v51 = vand.u32 %v2028_v8, %v2802_v12  ;;  %v1175_v19 = vunpack.c.l.b16 %v1071_v6  ;;  %v3199_v12 = vld [vmem:[%s2807_s27 + $0x18] sm:$0xff]  ;;  %v1076_v20 = vrot.slane %v1074_v16, 4  ;;  %v2558_v41 = vrot.slane %v3105_v27, 9 }
  0x6c   : > { %1739 = vmatpush.bf16.msra.mxu1 %v1730_v14  ;;  %v1083_v53 = vrot.slane %v1081_v26, 4  ;;  %v1084_v30 = vrot.slane %v3116_v55, 5  ;;  %v1088_v55 = vrot.slane %v2818_v18, 5  ;;  %v2559_v9 = vrot.slane %v2815_v17, 9 }
  0x6d   : > { %2042 = vmatpush.bf16.msra.mxu3 %v2033_v51  ;;  %v3187_v36 = vpack.c.b16 %v1175_v19, %v1174_v60  ;;  %v1078_v13 = vsel %vm3151_vm8, %v1076_v20, %v1077_v38  ;;  %v1082_v11 = vsel %vm3151_vm8, %v2558_v41, %v1081_v26  ;;  %v1091_v52 = vrot.slane %v2822_v21, 5  ;;  %v3269_v19 = vld [vmem:[%s2807_s27 + $0x3c] sm:$0xff] }
  0x6e   : > { %2575 = vmatmul.msk.bf16.vlgmr.msrb.gmra.mxu2 %vm674_vm4, %v1204_v2  ;;  %v1177_v44 = vunpack.c.l.b16 %v1078_v13  ;;  %v1085_v54 = vsel %vm3151_vm8, %v1083_v53, %v1084_v30  ;;  %v1178_v22 = vunpack.c.l.b16 %v1082_v11  ;;  %v1090_v58 = vrot.slane %v1088_v55, 4 }
  0x6f   : > { %v1179_v50 = vunpack.c.l.b16 %v1085_v54  ;;  %v1089_v49 = vsel %vm3151_vm8, %v2559_v9, %v1088_v55  ;;  %v1095_v51 = vrot.slane %v2883_v45, 5  ;;  %v1102_v53 = vrot.slane %v2958_v34, 5  ;;  %v3305_v54 = vld [vmem:[%s2807_s27 + $0x48] sm:$0xff] }
  0x70   : > { %v1092_v18 = vsel %vm3151_vm8, %v1090_v58, %v1091_v52  ;;  %v1180_v8 = vunpack.c.l.b16 %v1089_v49  ;;  %v1105_v55 = vrot.slane %v2961_v35, 5  ;;  %vm2363_vm9 = vcmask 60416  }
  0x71   : > { %v3233_v27 = vpack.c.b16 %v1179_v50, %v1178_v22  ;;  %v1181_v60 = vunpack.c.l.b16 %v1092_v18  ;;  %v2561_v22 = vrot.slane %v2951_v28, 9  ;;  %v1104_v50 = vrot.slane %v1102_v53, 4 }
  0x73   : > { %2595 = vmatmul.msk.bf16.vlgmr.msrb.gmra.mxu3 %vm674_vm4, %v2705_v48  ;;  %v3261_v21 = vpack.c.b16 %v1181_v60, %v1180_v8  ;;  %v1103_v34 = vsel %vm3151_vm8, %v2561_v22, %v1102_v53  ;;  %v1106_v58 = vsel %vm3151_vm8, %v1104_v50, %v1105_v55  ;;  %v1109_v60 = vrot.slane %v3046_v62, 5 }
  0x74   : > { %v1184_v49 = vunpack.c.l.b16 %v1103_v34  ;;  %v1185_v18 = vunpack.c.l.b16 %v1106_v58  ;;  %v2738_v58 = vld [vmem:[%s2807_s27 + $0x64] sm:$0xf] }
  0x76   : > { %v3327_v8 = vpack.c.b16 %v1185_v18, %v1184_v49  ;;  %v1116_v49 = vrot.slane %v2738_v58, 5 }
  0x78   : > { %2611 = vmatmul.msk.bf16.vlgmr.msrb.gmra.mxu0 %vm674_vm4, %v2997_v37  ;;  %v1075_v37 = vsel %vm3151_vm8, %v2557_v33, %v1074_v16  ;;  %v1097_v16 = vrot.slane %v1095_v51, 4  ;;  %v1098_v33 = vrot.slane %v2892_v59, 5 }
  0x79   : > { %v1176_v47 = vunpack.c.l.b16 %v1075_v37 }
  0x7a   : > { %2540 = vmatmul.msk.bf16.gmra.mxu1 %vm674_vm4, %v2705_v48  ;;  %v2560_v48 = vrot.slane %v2877_v40, 9  ;;  %v1099_v37 = vsel %vm3151_vm8, %v1097_v16, %v1098_v33  ;;  %v3337_v16 = vld [vmem:[%s2807_s27 + $0x54] sm:$0xff]  ;;  %v2562_v33 = vrot.slane %v3037_v39, 9 }
  0x7b   : > { %v3213_v63 = vpack.c.b16 %v1177_v44, %v1176_v47  ;;  %v1183_v59 = vunpack.c.l.b16 %v1099_v37  ;;  %4029 = vst [vmem:[#allocation22_spill] sm:$0xff] %v3337_v16  ;;  %v1112_v37 = vrot.slane %v3049_v4, 5 }
  0x7c   : > { %v1096_v45 = vsel %vm3151_vm8, %v2560_v48, %v1095_v51  ;;  %v1110_v62 = vsel %vm3151_vm8, %v2562_v33, %v1109_v60  ;;  %v2739_v33 = vld [vmem:[%s2807_s27 + $0x68] sm:$0x1] }
  0x7d   : > { %v1182_v47 = vunpack.c.l.b16 %v1096_v45  ;;  %v1111_v45 = vrot.slane %v1109_v60, 4  ;;  %v1186_v22 = vunpack.c.l.b16 %v1110_v62  ;;  %v2740_v62 = vld [vmem:[%s2807_s27 + $0x60] sm:$0xf] }
  0x7e   : > { %2576 = vmatmul.msk.bf16.gmra.mxu2 %vm674_vm4, %v3187_v36 }
  0x7f   : > { %v3293_v26 = vpack.c.b16 %v1183_v59, %v1182_v47  ;;  %v1113_v53 = vsel %vm3151_vm8, %v1111_v45, %v1112_v37  ;;  %v1119_v45 = vrot.slane %v2739_v33, 5  ;;  %v3372_v37 = vld [vmem:[%s2807_s27 + $0x60] sm:$0xff] }
  0x80   : > { %v1187_v4 = vunpack.c.l.b16 %v1113_v53  ;;  %4033 = vst [vmem:[#allocation26_spill] sm:$0xff] %v3372_v37  ;;  %v2563_v53 = vrot.slane %v2740_v62, 9 }
  0x82   : > { %v3359_v55 = vpack.c.b16 %v1187_v4, %v1186_v22  ;;  %v1117_v4 = vsel %vm3151_vm8, %v2563_v53, %v1116_v49 }
  0x83   : > { %2596 = vmatmul.msk.bf16.gmra.mxu3 %vm674_vm4, %v3199_v12 }
  0x84   : > { %4031 = vst [vmem:[#allocation24_spill] sm:$0xff] %v3359_v55 }
  0x88   : > { %2612 = vmatmul.msk.bf16.gmra.mxu0 %vm674_vm4, %v3085_v42 }
  0x8a   : > { %2541 = vmatmul.msk.bf16.gmra.mxu1 %vm674_vm4, %v3199_v12 }
  0x8e   : > { %2577 = vmatmul.msk.bf16.gmra.mxu2 %vm674_vm4, %v3213_v63 }
  0x93   : > { %2597 = vmatmul.msk.bf16.gmra.mxu3 %vm674_vm4, %v3219_v43 }
  0x98   : > { %2613 = vmatmul.msk.bf16.gmra.mxu0 %vm674_vm4, %v3173_v25 }
  0x9a   : > { %2542 = vmatmul.msk.bf16.gmra.mxu1 %vm674_vm4, %v3219_v43 }
  0x9d   : > { %v3236_v31 = vpop.f32.mrf.mxu1 }
  0x9e   : > { %2578 = vmatmul.msk.bf16.gmra.mxu2 %vm674_vm4, %v3233_v27 }
  0xa3   : > { %2598 = vmatmul.msk.bf16.gmra.mxu3 %vm674_vm4, %v3241_v23 }
  0xa5   : > { %v3253_v14 = vpop.f32.mrf.mxu1 }
  0xa6   : > { %v3251_v2 = vpop.f32.mrf.mxu2 }
  0xa8   : > { %2614 = vmatmul.msk.bf16.gmra.mxu0 %vm674_vm4, %v2853_v10 }
  0xaa   : > { %2543 = vmatmul.msk.bf16.gmra.mxu1 %vm674_vm4, %v3241_v23  ;;  %v3259_v17 = vpop.f32.mrf.mxu0 }
  0xac   : > { %v3263_v6 = vpop.f32.mrf.mxu3 }
  0xae   : > { %2579 = vmatmul.msk.bf16.gmra.mxu2 %vm674_vm4, %v3261_v21  ;;  %v3273_v20 = vpop.f32.mrf.mxu2 }
  0xb2   : > { %v3275_v38 = vpop.f32.mrf.mxu1  ;;  %v3283_v13 = vpop.f32.mrf.mxu0 }
  0xb3   : > { %2599 = vmatmul.msk.bf16.gmra.mxu3 %vm674_vm4, %v3269_v19 }
  0xb4   : > { %v3285_v40 = vpop.f32.mrf.mxu3 }
  0xb5   : > { %4026 = vst [vmem:[#allocation19_spill] sm:$0xff] %v3285_v40 }
  0xb8   : > { %2615 = vmatmul.msk.bf16.gmra.mxu0 %vm674_vm4, %v2939_v7 }
  0xba   : > { %2544 = vmatmul.msk.bf16.gmra.mxu1 %vm674_vm4, %v3269_v19  ;;  %v3291_v44 = vpop.f32.mrf.mxu1 }
  0xbb   : > { %v3295_v41 = vpop.f32.mrf.mxu2 }
  0xbe   : > { %2580 = vmatmul.msk.bf16.gmra.mxu2 %vm674_vm4, %v3293_v26 }
  0xbf   : > { %v3298_v30 = vpop.f32.mrf.mxu0 }
  0xc0   : > { %v3302_v11 = vpop.f32.mrf.mxu3 }
  0xc1   : > { %4027 = vst [vmem:[#allocation20_spill] sm:$0xff] %v3302_v11 }
  0xc3   : > { %v3309_v9 = vpop.f32.mrf.mxu1  ;;  %2600 = vmatmul.msk.bf16.gmra.mxu3 %vm674_vm4, %v3305_v54  ;;  %v3317_v52 = vpop.f32.mrf.mxu2 }
  0xc7   : > { %v3319_v28 = vpop.f32.mrf.mxu0 }
  0xc8   : > { %2616 = vmatmul.msk.bf16.gmra.mxu0 %vm674_vm4, %v3019_v3  ;;  %v3323_v35 = vpop.f32.mrf.mxu3 }
  0xc9   : > { %4028 = vst [vmem:[#allocation21_spill] sm:$0xff] %v3323_v35 }
  0xca   : > { %2545 = vmatmul.msk.bf16.gmra.mxu1 %vm674_vm4, %v3305_v54 }
  0xcb   : > { %v3330_v51 = vpop.f32.mrf.mxu1 }
  0xce   : > { %2581 = vmatmul.msk.bf16.gmra.mxu2 %vm674_vm4, %v3327_v8 }
  0xcf   : > { %v3334_v48 = vpop.f32.mrf.mxu2 }
  0xd1   : > { %v3341_v47 = vpop.f32.mrf.mxu0 }
  0xd3   : > { %v3343_v59 = vpop.f32.mrf.mxu3  ;;  %2601 = vmatmul.msk.bf16.gmra.mxu3 %vm674_vm4, %v3337_v16 }
  0xd4   : > { %4030 = vst [vmem:[#allocation23_spill] sm:$0xff] %v3343_v59  ;;  %v1118_v59 = vrot.slane %v1116_v49, 4 }
  0xd6   : > { %v1120_v58 = vsel %vm3151_vm8, %v1118_v59, %v1119_v45  ;;  %v1123_v59 = vrot.slane %v2903_v1, 5 }
  0xd7   : > { %v3351_v39 = vpop.f32.mrf.mxu1  ;;  %v3353_v50 = vpop.f32.mrf.mxu2  ;;  %v1189_v62 = vunpack.c.l.b16 %v1120_v58 }
  0xd8   : > { %2617 = vmatmul.msk.bf16.gmra.mxu0 %vm674_vm4, %v3108_v24 }
  0xd9   : > { %v3361_v34 = vpop.f32.mrf.mxu0 }
  0xda   : > { %2546 = vmatmul.msk.bf16.gmra.mxu1 %vm674_vm4, %v3337_v16 }
  0xdb   : > { %v3364_v18 = vpop.f32.mrf.mxu3 }
  0xdc   : > { %4032 = vst [vmem:[#allocation25_spill] sm:$0xff] %v3364_v18 }
  0xde   : > { %2582 = vmatmul.msk.bf16.gmra.mxu2 %vm674_vm4, %v3359_v55  ;;  %v1188_v55 = vunpack.c.l.b16 %v1117_v4  ;;  %v3405_v4 = vld [vmem:[%s2807_s27 + $0x6c] sm:$0xff] }
  0xdf   : > { %v3368_v60 = vpop.f32.mrf.mxu1 }
  0xe0   : > { %v3394_v49 = vpack.c.b16 %v1189_v62, %v1188_v55  ;;  %v1125_v55 = vrot.slane %v1123_v59, 4 }
  0xe1   : > { %v3375_v22 = vpop.f32.mrf.mxu2 }
  0xe2   : > { %4035 = vst [vmem:[#allocation28_spill] sm:$0xff] %v3394_v49 }
  0xe3   : > { %2602 = vmatmul.msk.bf16.gmra.mxu3 %vm674_vm4, %v3372_v37 }
  0xe5   : > { %v3383_v18 = vpop.f32.mrf.mxu0 }
  0xe6   : > { %v3385_v33 = vpop.f32.mrf.mxu3 }
  0xe7   : > { %4034 = vst [vmem:[#allocation27_spill] sm:$0xff] %v3385_v33  ;;  %v959_v35 = vpop.f32.mrf.mxu1  ;;  %v2564_v33 = vrot.slane %v2900_v0, 9 }
  0xe8   : > { %v960_v24 = vadd.f32 %v959_v35, %v3259_v17  ;;  %2618 = vmatmul.msk.bf16.gmra.mxu0 %vm674_vm4, %v2871_v32  ;;  %v1126_v35 = vrot.slane %v2913_v15, 5 }
  0xe9   : > { %v3390_v11 = vpop.f32.mrf.mxu2  ;;  %v1124_v1 = vsel %vm3151_vm8, %v2564_v33, %v1123_v59 }
  0xea   : > { %2547 = vmatmul.msk.bf16.gmra.mxu1 %vm674_vm4, %v3372_v37  ;;  %v1190_v16 = vunpack.c.l.b16 %v1124_v1 }
  0xed   : > { %v3397_v45 = vpop.f32.mrf.mxu0 }
  0xee   : > { %v3399_v53 = vpop.f32.mrf.mxu3  ;;  %2583 = vmatmul.msk.bf16.gmra.mxu2 %vm674_vm4, %v3394_v49 }
  0xef   : > { %4036 = vst [vmem:[#allocation29_spill] sm:$0xff] %v3399_v53  ;;  %v961_v17 = vpop.f32.mrf.mxu1  ;;  %v1127_v53 = vsel %vm3151_vm8, %v1125_v55, %v1126_v35  ;;  %v1130_v35 = vrot.slane %v2978_v57, 5 }
  0xf0   : > { %v962_v58 = vadd.f32 %v961_v17, %v3283_v13  ;;  %v1191_v40 = vunpack.c.l.b16 %v1127_v53  ;;  %v1133_v53 = vrot.slane %v2985_v5, 5 }
  0xf1   : > { %v1286_v62 = vpop.f32.mrf.mxu2 }
  0xf2   : > { %v1366_v32 = vadd.f32 %v1286_v62, %v960_v24  ;;  %v3422_v17 = vpack.c.b16 %v1191_v40, %v1190_v16  ;;  %v3429_v62 = vld [vmem:[%s2807_s27 + $0x78] sm:$0xff] }
  0xf3   : > { %2603 = vmatmul.msk.bf16.gmra.mxu3 %vm674_vm4, %v3405_v4 }
  0xf5   : > { %v1588_v49 = vpop.f32.mrf.mxu0 }
  0xf6   : > { %v1429_v15 = vpop.f32.mrf.mxu3 }
  0xf7   : > { %v964_v37 = vpop.f32.mrf.mxu1  ;;  %v1509_v13 = vadd.f32 %v1429_v15, %v1366_v32 }
  0xf8   : > { %v965_v0 = vadd.f32 %v964_v37, %v3298_v30  ;;  %2619 = vmatmul.msk.bf16.gmra.mxu0 %vm674_vm4, %v2953_v29 }
  0xf9   : > { %v1288_v24 = vpop.f32.mrf.mxu2  ;;  %v3420_v33 = vadd.f32 %v1588_v49, %v1509_v13  ;;  %v4037_v49 = vld [vmem:[#allocation4_spill] sm:$0xff] }
  0xfa   : > { %2548 = vmatmul.msk.bf16.gmra.mxu1 %vm674_vm4, %v3405_v4  ;;  %v1367_v59 = vadd.f32 %v1288_v24, %v962_v58  ;;  %v2565_v15 = vrot.slane %v4037_v49, 9  ;;  %v1132_v58 = vrot.slane %v1130_v35, 4 }
  0xfc   : > { %v1131_v5 = vsel %vm3151_vm8, %v2565_v15, %v1130_v35  ;;  %v1134_v13 = vsel %vm3151_vm8, %v1132_v58, %v1133_v53  ;;  %v4041_v58 = vld [vmem:[#allocation12_spill] sm:$0xff] }
  0xfd   : > { %v1590_v55 = vpop.f32.mrf.mxu0 }
  0xfe   : > { %v1431_v32 = vpop.f32.mrf.mxu3  ;;  %2584 = vmatmul.msk.bf16.gmra.mxu2 %vm674_vm4, %v3422_v17 }
  0xff   : > { %v966_v30 = vpop.f32.mrf.mxu1  ;;  %v1510_v37 = vadd.f32 %v1431_v32, %v1367_v59 }
 0x100   : > { %v967_v1 = vadd.f32 %v966_v30, %v3319_v28  ;;  %v1192_v28 = vunpack.c.l.b16 %v1131_v5  ;;  %v1193_v30 = vunpack.c.l.b16 %v1134_v13  ;;  %v4042_v13 = vld [vmem:[#allocation13_spill] sm:$0xff] }
 0x101   : > { %v1291_v40 = vpop.f32.mrf.mxu2  ;;  %v3433_v16 = vadd.f32 %v1590_v55, %v1510_v37  ;;  %v4039_v37 = vld [vmem:[#allocation9_spill] sm:$0xff] }
 0x102   : > { %v1368_v57 = vadd.f32 %v1291_v40, %v965_v0  ;;  %v3448_v53 = vpack.c.b16 %v1193_v30, %v1192_v28  ;;  %v1137_v40 = vrot.slane %v4041_v58, 5 }
 0x103   : > { %4038 = vst [vmem:[#allocation4_spill] sm:$0xff] %v3433_v16  ;;  %2604 = vmatmul.msk.bf16.gmra.mxu3 %vm674_vm4, %v3429_v62  ;;  %v1140_v16 = vrot.slane %v4042_v13, 5 }
 0x105   : > { %v1593_v24 = vpop.f32.mrf.mxu0 }
 0x106   : > { %v1434_v59 = vpop.f32.mrf.mxu3 }
 0x107   : > { %v969_v32 = vpop.f32.mrf.mxu1  ;;  %v1511_v49 = vadd.f32 %v1434_v59, %v1368_v57 }
 0x108   : > { %v970_v55 = vadd.f32 %v969_v32, %v3341_v47  ;;  %2620 = vmatmul.msk.bf16.gmra.mxu0 %vm674_vm4, %v4039_v37  ;;  %v3455_v32 = vld [vmem:[%s2807_s27 + $0x84] sm:$0xff] }
 0x109   : > { %v1293_v0 = vpop.f32.mrf.mxu2  ;;  %v3446_v35 = vadd.f32 %v1593_v24, %v1511_v49  ;;  %4043 = vst [vmem:[#allocation12_spill] sm:$0xff] %v3455_v32  ;;  %v4044_v24 = vld [vmem:[#allocation10_spill] sm:$0xff] }
 0x10a   : > { %2549 = vmatmul.msk.bf16.gmra.mxu1 %vm674_vm4, %v3429_v62  ;;  %v1369_v15 = vadd.f32 %v1293_v0, %v967_v1  ;;  %v2566_v49 = vrot.slane %v4044_v24, 9  ;;  %v1139_v1 = vrot.slane %v1137_v40, 4 }
 0x10b   : > { %4040 = vst [vmem:[#allocation30_spill] sm:$0xff] %v3446_v35 }
 0x10c   : > { %v1138_v58 = vsel %vm3151_vm8, %v2566_v49, %v1137_v40 }
 0x10d   : > { %v1595_v5 = vpop.f32.mrf.mxu0 }
 0x10e   : > { %v1436_v57 = vpop.f32.mrf.mxu3  ;;  %2585 = vmatmul.msk.bf16.gmra.mxu2 %vm674_vm4, %v3448_v53 }
 0x10f   : > { %v971_v47 = vpop.f32.mrf.mxu1  ;;  %v1512_v59 = vadd.f32 %v1436_v57, %v1369_v15  ;;  %v1141_v15 = vsel %vm3151_vm8, %v1139_v1, %v1140_v16  ;;  %v2741_v1 = vld [vmem:[%s2807_s27 + $0x94] sm:$0xf] }
 0x110   : > { %v972_v37 = vadd.f32 %v971_v47, %v3361_v34  ;;  %v1194_v47 = vunpack.c.l.b16 %v1138_v58  ;;  %v1195_v24 = vunpack.c.l.b16 %v1141_v15 }
 0x111   : > { %v1296_v28 = vpop.f32.mrf.mxu2  ;;  %v3459_v30 = vadd.f32 %v1595_v5, %v1512_v59 }
 0x112   : > { %v1370_v0 = vadd.f32 %v1296_v28, %v970_v55  ;;  %v4046_v55 = vld [vmem:[#allocation18_spill] sm:$0xff]  ;;  %v3474_v49 = vpack.c.b16 %v1195_v24, %v1194_v47  ;;  %v1144_v28 = vrot.slane %v2741_v1, 5 }
 0x113   : > { %4045 = vst [vmem:[#allocation13_spill] sm:$0xff] %v3459_v30  ;;  %2605 = vmatmul.msk.bf16.gmra.mxu3 %vm674_vm4, %v3455_v32  ;;  %v3481_v30 = vld [vmem:[%s2807_s27 + $0x90] sm:$0xff] }
 0x114   : > { %4048 = vst [vmem:[#allocation31_spill] sm:$0xff] %v3474_v49 }
 0x115   : > { %v1598_v13 = vpop.f32.mrf.mxu0  ;;  %4049 = vst [vmem:[#allocation32_spill] sm:$0xff] %v3481_v30 }
 0x116   : > { %v1439_v34 = vpop.f32.mrf.mxu3 }
 0x117   : > { %v974_v57 = vpop.f32.mrf.mxu1  ;;  %v1513_v35 = vadd.f32 %v1439_v34, %v1370_v0  ;;  %v2742_v0 = vld [vmem:[%s2807_s27 + $0x98] sm:$0x1] }
 0x118   : > { %v975_v5 = vadd.f32 %v974_v57, %v3383_v18  ;;  %2621 = vmatmul.msk.bf16.gmra.mxu0 %vm674_vm4, %v4046_v55  ;;  %v1147_v15 = vrot.slane %v2742_v0, 5 }
 0x119   : > { %v1298_v59 = vpop.f32.mrf.mxu2  ;;  %v3472_v40 = vadd.f32 %v1598_v13, %v1513_v35  ;;  %v2743_v35 = vld [vmem:[%s2807_s27 + $0x90] sm:$0xf] }
 0x11a   : > { %2550 = vmatmul.msk.bf16.gmra.mxu1 %vm674_vm4, %v3455_v32  ;;  %v1371_v16 = vadd.f32 %v1298_v59, %v972_v37  ;;  %v2567_v13 = vrot.slane %v2743_v35, 9  ;;  %v1146_v37 = vrot.slane %v1144_v28, 4 }
 0x11b   : > { %4047 = vst [vmem:[#allocation10_spill] sm:$0xff] %v3472_v40 }
 0x11c   : > { %v1145_v1 = vsel %vm3151_vm8, %v2567_v13, %v1144_v28  ;;  %v2744_v13 = vld [vmem:[%s2807_s27 + $0xa0] sm:$0xf] }
 0x11d   : > { %v1600_v58 = vpop.f32.mrf.mxu0 }
 0x11e   : > { %v1441_v18 = vpop.f32.mrf.mxu3  ;;  %2586 = vmatmul.msk.bf16.gmra.mxu2 %vm674_vm4, %v3474_v49  ;;  %v2746_v49 = vld [vmem:[%s2807_s27 + $0x9c] sm:$0xf] }
 0x11f   : > { %v976_v34 = vpop.f32.mrf.mxu1  ;;  %v1514_v57 = vadd.f32 %v1441_v18, %v1371_v16  ;;  %v1148_v16 = vsel %vm3151_vm8, %v1146_v37, %v1147_v15  ;;  %v1151_v37 = vrot.slane %v2744_v13, 5 }
 0x120   : > { %v977_v55 = vadd.f32 %v976_v34, %v3397_v45  ;;  %v1196_v34 = vunpack.c.l.b16 %v1145_v1  ;;  %v1197_v35 = vunpack.c.l.b16 %v1148_v16  ;;  %v2745_v16 = vld [vmem:[%s2807_s27 + $0xa4] sm:$0x1] }
 0x121   : > { %v1301_v47 = vpop.f32.mrf.mxu2  ;;  %v3485_v24 = vadd.f32 %v1600_v58, %v1514_v57  ;;  %v4051_v58 = vld [vmem:[#allocation3_spill] sm:$0xff] }
 0x122   : > { %v1372_v59 = vadd.f32 %v1301_v47, %v975_v5  ;;  %v3499_v15 = vpack.c.b16 %v1197_v35, %v1196_v34 }
 0x123   : > { %4050 = vst [vmem:[#allocation33_spill] sm:$0xff] %v3485_v24  ;;  %2606 = vmatmul.msk.bf16.gmra.mxu3 %vm674_vm4, %v3481_v30 }
 0x124   : > { %4053 = vst [vmem:[#allocation35_spill] sm:$0xff] %v3499_v15 }
 0x125   : > { %v1603_v0 = vpop.f32.mrf.mxu0 }
 0x126   : > { %v1444_v18 = vpop.f32.mrf.mxu3 }
 0x127   : > { %v979_v45 = vpop.f32.mrf.mxu1  ;;  %v1515_v40 = vadd.f32 %v1444_v18, %v1372_v59  ;;  %v1154_v18 = vrot.slane %v2745_v16, 5 }
 0x128   : > { %2622 = vmatmul.msk.bf16.gmra.mxu0 %vm674_vm4, %v4051_v58  ;;  %v3506_v58 = vld [vmem:[%s2807_s27 + $0x9c] sm:$0xff] }
 0x129   : > { %v1303_v5 = vpop.f32.mrf.mxu2  ;;  %v3497_v28 = vadd.f32 %v1603_v0, %v1515_v40  ;;  %4054 = vst [vmem:[#allocation36_spill] sm:$0xff] %v3506_v58  ;;  %v1153_v40 = vrot.slane %v1151_v37, 4 }
 0x12a   : > { %2551 = vmatmul.msk.bf16.gmra.mxu1 %vm674_vm4, %v3481_v30  ;;  %v1373_v57 = vadd.f32 %v1303_v5, %v977_v55  ;;  %v2568_v30 = vrot.slane %v2746_v49, 9  ;;  %v980_v55 = vadd.f32 %v979_v45, %v3236_v31  ;;  %v4056_v45 = vld [vmem:[#allocation5_spill] sm:$0xff] }
 0x12b   : > { %4052 = vst [vmem:[#allocation34_spill] sm:$0xff] %v3497_v28 }
 0x12c   : > { %v1152_v5 = vsel %vm3151_vm8, %v2568_v30, %v1151_v37 }
 0x12d   : > { %v1605_v47 = vpop.f32.mrf.mxu0  ;;  %v1198_v49 = vunpack.c.l.b16 %v1152_v5 }
 0x12e   : > { %v1446_v1 = vpop.f32.mrf.mxu3  ;;  %2587 = vmatmul.msk.bf16.gmra.mxu2 %vm674_vm4, %v3499_v15 }
 0x12f   : > { %v981_v59 = vpop.f32.mrf.mxu1  ;;  %v1516_v24 = vadd.f32 %v1446_v1, %v1373_v57  ;;  %v1155_v57 = vsel %vm3151_vm8, %v1153_v40, %v1154_v18  ;;  %v4059_v40 = vld [vmem:[#allocation7_spill] sm:$0xff] }
 0x130   : > { %v1199_v28 = vunpack.c.l.b16 %v1155_v57  ;;  %v4060_v57 = vld [vmem:[#allocation8_spill] sm:$0xff] }
 0x131   : > { %v1306_v0 = vpop.f32.mrf.mxu2  ;;  %v3510_v34 = vadd.f32 %v1605_v47, %v1516_v24  ;;  %v982_v24 = vadd.f32 %v981_v59, %v3253_v14  ;;  %v3532_v59 = vld [vmem:[%s2807_s27 + $0xa8] sm:$0xff] }
 0x132   : > { %v1374_v35 = vadd.f32 %v1306_v0, %v980_v55  ;;  %v3525_v18 = vpack.c.b16 %v1199_v28, %v1198_v49  ;;  %v1158_v55 = vrot.slane %v4059_v40, 5  ;;  %4061 = vst [vmem:[#allocation7_spill] sm:$0xff] %v3532_v59 }
 0x133   : > { %4055 = vst [vmem:[#allocation37_spill] sm:$0xff] %v3510_v34  ;;  %2607 = vmatmul.msk.bf16.gmra.mxu3 %vm674_vm4, %v3506_v58  ;;  %v4062_v34 = vld [vmem:[#allocation6_spill] sm:$0xff] }
 0x134   : > { %4058 = vst [vmem:[#allocation39_spill] sm:$0xff] %v3525_v18 }
 0x135   : > { %v1608_v13 = vpop.f32.mrf.mxu0 }
 0x136   : > { %v1449_v1 = vpop.f32.mrf.mxu3 }
 0x137   : > { %v984_v16 = vpop.f32.mrf.mxu1  ;;  %v1517_v31 = vadd.f32 %v1449_v1, %v1374_v35  ;;  %v1161_v1 = vrot.slane %v4060_v57, 5 }
 0x138   : > { %2623 = vmatmul.msk.bf16.gmra.mxu0 %vm674_vm4, %v4056_v45  ;;  %v2569_v45 = vrot.slane %v4062_v34, 9 }
 0x139   : > { %v1308_v47 = vpop.f32.mrf.mxu2  ;;  %v3523_v30 = vadd.f32 %v1608_v13, %v1517_v31  ;;  %v1160_v13 = vrot.slane %v1158_v55, 4  ;;  %v985_v31 = vadd.f32 %v984_v16, %v3275_v38 }
 0x13a   : > { %2552 = vmatmul.msk.bf16.gmra.mxu1 %vm674_vm4, %v3506_v58  ;;  %v1375_v37 = vadd.f32 %v1308_v47, %v982_v24  ;;  %v1159_v47 = vsel %vm3151_vm8, %v2569_v45, %v1158_v55  ;;  %v3550_v45 = vld [vmem:[%s2807_s27 + $0xc0] sm:$0xf] }
 0x13b   : > { %4057 = vst [vmem:[#allocation38_spill] sm:$0xff] %v3523_v30  ;;  %v1200_v57 = vunpack.c.l.b16 %v1159_v47  ;;  %v4064_v30 = vld [vmem:[#allocation11_spill] sm:$0xff]  ;;  %v1542_v47 = vshrl.u32 %v3550_v45, 16 }
 0x13c   : > { %4065 = vst [vmem:[#allocation6_spill] sm:$0xff] %v3550_v45 }
 0x13d   : > { %v1610_v0 = vpop.f32.mrf.mxu0 }
 0x13e   : > { %v1451_v5 = vpop.f32.mrf.mxu3  ;;  %2588 = vmatmul.msk.bf16.gmra.mxu2 %vm674_vm4, %v3525_v18 }
 0x13f   : > { %v986_v35 = vpop.f32.mrf.mxu1  ;;  %v1518_v14 = vadd.f32 %v1451_v5, %v1375_v37  ;;  %v1162_v37 = vsel %vm3151_vm8, %v1160_v13, %v1161_v1 }
 0x140   : > { %v1201_v38 = vunpack.c.l.b16 %v1162_v37 }
 0x141   : > { %v1311_v28 = vpop.f32.mrf.mxu2  ;;  %v3536_v49 = vadd.f32 %v1610_v0, %v1518_v14  ;;  %v987_v0 = vadd.f32 %v986_v35, %v3291_v44  ;;  %v1545_v44 = vshll.u32 %v3550_v45, 16 }
 0x142   : > { %v1376_v24 = vadd.f32 %v1311_v28, %v985_v31  ;;  %v3554_v13 = vpack.c.b16 %v1201_v38, %v1200_v57  ;;  %v3557_v31 = vld [vmem:[%s2807_s27 + $0xc4] sm:$0xf]  ;;  %v4069_v28 = vld [vmem:[#allocation15_spill] sm:$0xff]  ;;  %v4070_v57 = vld [vmem:[#allocation16_spill] sm:$0xff] }
 0x143   : > { %4063 = vst [vmem:[#allocation8_spill] sm:$0xff] %v3536_v49  ;;  %2608 = vmatmul.msk.bf16.gmra.mxu3 %vm674_vm4, %v3532_v59  ;;  %v1551_v35 = vshll.u32 %v3557_v31, 16  ;;  %v1168_v38 = vrot.slane %v4070_v57, 5  ;;  %v1547_v18 = vrot.slane %v1545_v44, 5 }
 0x144   : > { %4067 = vst [vmem:[#allocation41_spill] sm:$0xff] %v3554_v13 }
 0x145   : > { %v1613_v40 = vpop.f32.mrf.mxu0  ;;  %4068 = vst [vmem:[#allocation42_spill] sm:$0xff] %v3557_v31 }
 0x146   : > { %v1454_v34 = vpop.f32.mrf.mxu3 }
 0x147   : > { %v989_v5 = vpop.f32.mrf.mxu1  ;;  %v1519_v16 = vadd.f32 %v1454_v34, %v1376_v24  ;;  %v1165_v24 = vrot.slane %v4069_v28, 5  ;;  %v1555_v34 = vshrl.u32 %v3557_v31, 16  ;;  %v1553_v31 = vrot.slane %v1551_v35, 5 }
 0x148   : > { %2624 = vmatmul.msk.bf16.gmra.mxu0 %vm674_vm4, %v4064_v30  ;;  %v990_v45 = vadd.f32 %v989_v5, %v3309_v9  ;;  %v1544_v30 = vrot.slane %v1542_v47, 4 }
 0x149   : > { %v1313_v14 = vpop.f32.mrf.mxu2  ;;  %v3552_v55 = vadd.f32 %v1613_v40, %v1519_v16  ;;  %v1557_v58 = vrot.slane %v1555_v34, 4 }
 0x14a   : > { %2553 = vmatmul.msk.bf16.gmra.mxu1 %vm674_vm4, %v3532_v59  ;;  %v1377_v1 = vadd.f32 %v1313_v14, %v987_v0  ;;  %v3568_v0 = vld [vmem:[%s2807_s27 + $0xb4] sm:$0xff]  ;;  %v4071_v14 = vld [vmem:[#allocation14_spill] sm:$0xff]  ;;  %v1548_v5 = vor.u32 %v1547_v18, %v1544_v30 }
 0x14b   : > { %4066 = vst [vmem:[#allocation40_spill] sm:$0xff] %v3552_v55  ;;  %v2570_v28 = vrot.slane %v4071_v14, 9  ;;  %v1167_v55 = vrot.slane %v1165_v24, 4  ;;  %v1558_v47 = vor.u32 %v1557_v58, %v1553_v31 }
 0x14d   : > { %v1615_v37 = vpop.f32.mrf.mxu0  ;;  %v1559_v30 = vrot.slane %v1558_v47, 4 }
 0x14e   : > { %v1456_v49 = vpop.f32.mrf.mxu3  ;;  %2589 = vmatmul.msk.bf16.gmra.mxu2 %vm674_vm4, %v3554_v13  ;;  %v3575_v13 = vld [vmem:[%s2807_s27 + $0xc8] sm:$0x1] }
 0x14f   : > { %v991_v40 = vpop.f32.mrf.mxu1  ;;  %v1520_v16 = vadd.f32 %v1456_v49, %v1377_v1  ;;  %v1166_v49 = vsel %vm3151_vm8, %v2570_v28, %v1165_v24  ;;  %v1169_v1 = vsel %vm3151_vm8, %v1167_v55, %v1168_v38  ;;  %v1561_v44 = vshll.u32 %v3575_v13, 16 }
 0x150   : > { %v1202_v34 = vunpack.c.l.b16 %v1166_v49  ;;  %v992_v57 = vadd.f32 %v991_v40, %v3330_v51  ;;  %v1549_v55 = vrot.slane %v1548_v5, 4 }
 0x151   : > { %v1316_v59 = vpop.f32.mrf.mxu2  ;;  %v3572_v15 = vadd.f32 %v1615_v37, %v1520_v16  ;;  %v1563_v58 = vrot.slane %v1561_v44, 5 }
 0x152   : > { %v1378_v32 = vadd.f32 %v1316_v59, %v990_v45  ;;  %v1203_v59 = vunpack.c.l.b16 %v1169_v1  ;;  %v3600_v1 = vld [vmem:[%s2807_s27 + $0xc0] sm:$0xff] }
 0x153   : > { %2609 = vmatmul.msk.bf16.gmra.mxu3 %vm674_vm4, %v3568_v0  ;;  %v1564_v51 = vsel %vm2838_vm5, %v1559_v30, %v1563_v58 }
 0x154   : > { %v3591_v16 = vpack.c.b16 %v1203_v59, %v1202_v34  ;;  %v1567_v47 = vunpack.c.l.b16 %v1564_v51 }
 0x155   : > { %v1618_v9 = vpop.f32.mrf.mxu0 }
 0x156   : > { %v1459_v35 = vpop.f32.mrf.mxu3 }
 0x157   : > { %v994_v37 = vpop.f32.mrf.mxu1  ;;  %v1521_v45 = vadd.f32 %v1459_v35, %v1378_v32  ;;  %v1554_v32 = vsel %vm2838_vm5, %v1549_v55, %v1553_v31 }
 0x158   : > { %2625 = vmatmul.msk.bf16.gmra.mxu0 %vm674_vm4, %v3157_v56  ;;  %v1566_v5 = vunpack.c.l.b16 %v1554_v32 }
 0x159   : > { %v1318_v24 = vpop.f32.mrf.mxu2  ;;  %v3589_v18 = vadd.f32 %v1618_v9, %v1521_v45  ;;  %v995_v9 = vadd.f32 %v994_v37, %v3351_v39 }
 0x15a   : > { %2554 = vmatmul.msk.bf16.gmra.mxu1 %vm674_vm4, %v3568_v0  ;;  %v1379_v38 = vadd.f32 %v1318_v24, %v992_v57  ;;  %v3607_v31 = vpack.c.b16 %v1567_v47, %v1566_v5 }
 0x15d   : > { %v1620_v14 = vpop.f32.mrf.mxu0 }
 0x15e   : > { %v1461_v40 = vpop.f32.mrf.mxu3  ;;  %2590 = vmatmul.msk.bf16.gmra.mxu2 %vm674_vm4, %v3591_v16 }
 0x15f   : > { %v996_v28 = vpop.f32.mrf.mxu1  ;;  %v1522_v49 = vadd.f32 %v1461_v40, %v1379_v38 }
 0x160   : > { %v997_v39 = vadd.f32 %v996_v28, %v3368_v60 }
 0x161   : > { %v1321_v44 = vpop.f32.mrf.mxu2  ;;  %v3603_v35 = vadd.f32 %v1620_v14, %v1522_v49 }
 0x162   : > { %v1380_v34 = vadd.f32 %v1321_v44, %v995_v9 }
 0x163   : > { %2610 = vmatmul.msk.bf16.gmra.mxu3 %vm674_vm4, %v3600_v1 }
 0x165   : > { %v1623_v59 = vpop.f32.mrf.mxu0 }
 0x166   : > { %v1464_v45 = vpop.f32.mrf.mxu3 }
 0x167   : > { %v999_v57 = vpop.f32.mrf.mxu1  ;;  %v1523_v24 = vadd.f32 %v1464_v45, %v1380_v34 }
 0x168   : > { %2626 = vmatmul.msk.bf16.gmra.mxu0 %vm674_vm4, %v3607_v31  ;;  %v1000_v51 = vadd.f32 %v999_v57, %v3251_v2 }
 0x169   : > { %v1323_v37 = vpop.f32.mrf.mxu2  ;;  %v3614_v55 = vadd.f32 %v1623_v59, %v1523_v24 }
 0x16a   : > { %2632 = vmatmul.msk.bf16.vlgmr.msra.gmra.mxu1 %vm674_vm4, %v3187_v36  ;;  %v1381_v30 = vadd.f32 %v1323_v37, %v997_v39 }
 0x16d   : > { %v1625_v58 = vpop.f32.mrf.mxu0 }
 0x16e   : > { %v1466_v38 = vpop.f32.mrf.mxu3  ;;  %2652 = vmatmul.msk.bf16.vlgmr.msra.gmra.mxu2 %vm674_vm4, %v3199_v12 }
 0x16f   : > { %v1001_v14 = vpop.f32.mrf.mxu1  ;;  %v1524_v32 = vadd.f32 %v1466_v38, %v1381_v30 }
 0x170   : > { %v1002_v12 = vadd.f32 %v1001_v14, %v3273_v20 }
 0x171   : > { %v1326_v40 = vpop.f32.mrf.mxu2  ;;  %v3619_v49 = vadd.f32 %v1625_v58, %v1524_v32 }
 0x172   : > { %v1382_v60 = vadd.f32 %v1326_v40, %v1000_v51 }
 0x173   : > { %2668 = vmatmul.msk.bf16.vlgmr.msra.gmra.mxu3 %vm674_vm4, %v3085_v42 }
 0x175   : > { %v1628_v36 = vpop.f32.mrf.mxu0 }
 0x176   : > { %v1469_v28 = vpop.f32.mrf.mxu3 }
 0x177   : > { %v1004_v9 = vpop.f32.mrf.mxu1  ;;  %v1525_v5 = vadd.f32 %v1469_v28, %v1382_v60 }
 0x178   : > { %2685 = vmatmul.msk.bf16.vlgmr.msra.gmra.mxu0 %vm674_vm4, %v3213_v63  ;;  %v1005_v57 = vadd.f32 %v1004_v9, %v3295_v41 }
 0x179   : > { %v1328_v47 = vpop.f32.mrf.mxu2  ;;  %v3628_v2 = vadd.f32 %v1628_v36, %v1525_v5 }
 0x17a   : > { %2633 = vmatmul.msk.bf16.gmra.mxu1 %vm674_vm4, %v3213_v63  ;;  %v1383_v44 = vadd.f32 %v1328_v47, %v1002_v12 }
 0x17d   : > { %v1630_v34 = vpop.f32.mrf.mxu0 }
 0x17e   : > { %v1471_v59 = vpop.f32.mrf.mxu3  ;;  %2653 = vmatmul.msk.bf16.gmra.mxu2 %vm674_vm4, %v3219_v43 }
 0x17f   : > { %v1006_v42 = vpop.f32.mrf.mxu1  ;;  %v1526_v45 = vadd.f32 %v1471_v59, %v1383_v44 }
 0x180   : > { %v1007_v43 = vadd.f32 %v1006_v42, %v3317_v52 }
 0x181   : > { %v1331_v24 = vpop.f32.mrf.mxu2  ;;  %v3633_v39 = vadd.f32 %v1630_v34, %v1526_v45 }
 0x182   : > { %v1384_v20 = vadd.f32 %v1331_v24, %v1005_v57 }
 0x183   : > { %2669 = vmatmul.msk.bf16.gmra.mxu3 %vm674_vm4, %v3173_v25 }
 0x185   : > { %v1633_v63 = vpop.f32.mrf.mxu0 }
 0x186   : > { %v1474_v37 = vpop.f32.mrf.mxu3 }
 0x187   : > { %v1009_v30 = vpop.f32.mrf.mxu1  ;;  %v1527_v58 = vadd.f32 %v1474_v37, %v1384_v20 }
 0x188   : > { %2686 = vmatmul.msk.bf16.gmra.mxu0 %vm674_vm4, %v3233_v27  ;;  %v1010_v60 = vadd.f32 %v1009_v30, %v3334_v48 }
 0x189   : > { %v1333_v38 = vpop.f32.mrf.mxu2  ;;  %v3642_v41 = vadd.f32 %v1633_v63, %v1527_v58 }
 0x18a   : > { %2634 = vmatmul.msk.bf16.gmra.mxu1 %vm674_vm4, %v3233_v27  ;;  %v1385_v14 = vadd.f32 %v1333_v38, %v1007_v43 }
 0x18d   : > { %v1635_v32 = vpop.f32.mrf.mxu0 }
 0x18e   : > { %v1476_v51 = vpop.f32.mrf.mxu3  ;;  %2654 = vmatmul.msk.bf16.gmra.mxu2 %vm674_vm4, %v3241_v23 }
 0x18f   : > { %v1011_v25 = vpop.f32.mrf.mxu1  ;;  %v1528_v40 = vadd.f32 %v1476_v51, %v1385_v14 }
 0x190   : > { %v1012_v23 = vadd.f32 %v1011_v25, %v3353_v50 }
 0x191   : > { %v1336_v36 = vpop.f32.mrf.mxu2  ;;  %v3647_v28 = vadd.f32 %v1635_v32, %v1528_v40 }
 0x192   : > { %v1386_v52 = vadd.f32 %v1336_v36, %v1010_v60 }
 0x193   : > { %2670 = vmatmul.msk.bf16.gmra.mxu3 %vm674_vm4, %v2853_v10 }
 0x195   : > { %v1638_v27 = vpop.f32.mrf.mxu0 }
 0x196   : > { %v1479_v9 = vpop.f32.mrf.mxu3 }
 0x197   : > { %v1014_v5 = vpop.f32.mrf.mxu1  ;;  %v1529_v12 = vadd.f32 %v1479_v9, %v1386_v52  ;;  %v4072_v52 = vld [vmem:[#allocation19_spill] sm:$0xff] }
 0x198   : > { %2687 = vmatmul.msk.bf16.gmra.mxu0 %vm674_vm4, %v3261_v21  ;;  %v1015_v45 = vadd.f32 %v1014_v5, %v3375_v22 }
 0x199   : > { %v1338_v47 = vpop.f32.mrf.mxu2  ;;  %v3656_v48 = vadd.f32 %v1638_v27, %v1529_v12 }
 0x19a   : > { %2635 = vmatmul.msk.bf16.gmra.mxu1 %vm674_vm4, %v3261_v21  ;;  %v1387_v44 = vadd.f32 %v1338_v47, %v1012_v23  ;;  %v4073_v23 = vld [vmem:[#allocation22_spill] sm:$0xff] }
 0x19d   : > { %v1640_v34 = vpop.f32.mrf.mxu0 }
 0x19e   : > { %v1481_v59 = vpop.f32.mrf.mxu3  ;;  %2655 = vmatmul.msk.bf16.gmra.mxu2 %vm674_vm4, %v3269_v19 }
 0x19f   : > { %v1016_v10 = vpop.f32.mrf.mxu1  ;;  %v1530_v42 = vadd.f32 %v1481_v59, %v1387_v44  ;;  %v4074_v44 = vld [vmem:[#allocation20_spill] sm:$0xff] }
 0x1a0   : > { %v1017_v19 = vadd.f32 %v1016_v10, %v3390_v11 }
 0x1a1   : > { %v1341_v57 = vpop.f32.mrf.mxu2  ;;  %v3661_v24 = vadd.f32 %v1640_v34, %v1530_v42 }
 0x1a2   : > { %v1388_v50 = vadd.f32 %v1341_v57, %v1015_v45  ;;  %v4075_v45 = vld [vmem:[#allocation17_spill] sm:$0xff] }
 0x1a3   : > { %2671 = vmatmul.msk.bf16.gmra.mxu3 %vm674_vm4, %v2939_v7 }
 0x1a5   : > { %v1643_v21 = vpop.f32.mrf.mxu0 }
 0x1a6   : > { %v1484_v20 = vpop.f32.mrf.mxu3 }
 0x1a7   : > { %v1019_v63 = vpop.f32.mrf.mxu1  ;;  %v1531_v37 = vadd.f32 %v1484_v20, %v1388_v50  ;;  %v4076_v20 = vld [vmem:[#allocation24_spill] sm:$0xff] }
 0x1a8   : > { %2688 = vmatmul.msk.bf16.gmra.mxu0 %vm674_vm4, %v3293_v26  ;;  %v1020_v32 = vadd.f32 %v1019_v63, %v3263_v6  ;;  %v4077_v63 = vld [vmem:[#allocation21_spill] sm:$0xff] }
 0x1a9   : > { %v1343_v30 = vpop.f32.mrf.mxu2  ;;  %v3670_v22 = vadd.f32 %v1643_v21, %v1531_v37 }
 0x1aa   : > { %2636 = vmatmul.msk.bf16.gmra.mxu1 %vm674_vm4, %v3293_v26  ;;  %v1389_v58 = vadd.f32 %v1343_v30, %v1017_v19 }
 0x1ad   : > { %v1645_v43 = vpop.f32.mrf.mxu0 }
 0x1ae   : > { %v1486_v38 = vpop.f32.mrf.mxu3  ;;  %2656 = vmatmul.msk.bf16.gmra.mxu2 %vm674_vm4, %v3305_v54 }
 0x1af   : > { %v1021_v7 = vpop.f32.mrf.mxu1  ;;  %v1532_v14 = vadd.f32 %v1486_v38, %v1389_v58 }
 0x1b0   : > { %v1022_v54 = vadd.f32 %v1021_v7, %v4072_v52  ;;  %v4078_v7 = vld [vmem:[#allocation26_spill] sm:$0xff] }
 0x1b1   : > { %v1346_v51 = vpop.f32.mrf.mxu2  ;;  %v3675_v25 = vadd.f32 %v1645_v43, %v1532_v14 }
 0x1b2   : > { %v1390_v11 = vadd.f32 %v1346_v51, %v1020_v32  ;;  %v4079_v51 = vld [vmem:[#allocation23_spill] sm:$0xff] }
 0x1b3   : > { %2672 = vmatmul.msk.bf16.gmra.mxu3 %vm674_vm4, %v3019_v3 }
 0x1b5   : > { %v1648_v26 = vpop.f32.mrf.mxu0 }
 0x1b6   : > { %v1489_v40 = vpop.f32.mrf.mxu3 }
 0x1b7   : > { %v1024_v60 = vpop.f32.mrf.mxu1  ;;  %v1533_v36 = vadd.f32 %v1489_v40, %v1390_v11 }
 0x1b8   : > { %2689 = vmatmul.msk.bf16.gmra.mxu0 %vm674_vm4, %v3327_v8  ;;  %v1025_v34 = vadd.f32 %v1024_v60, %v4074_v44 }
 0x1b9   : > { %v1348_v27 = vpop.f32.mrf.mxu2  ;;  %v3684_v6 = vadd.f32 %v1648_v26, %v1533_v36  ;;  %v4080_v36 = vld [vmem:[#allocation2_spill] sm:$0xff] }
 0x1ba   : > { %2637 = vmatmul.msk.bf16.gmra.mxu1 %vm674_vm4, %v3327_v8  ;;  %v1391_v9 = vadd.f32 %v1348_v27, %v1022_v54 }
 0x1bd   : > { %v1650_v5 = vpop.f32.mrf.mxu0 }
 0x1be   : > { %v1491_v12 = vpop.f32.mrf.mxu3  ;;  %2657 = vmatmul.msk.bf16.gmra.mxu2 %vm674_vm4, %v4073_v23 }
 0x1bf   : > { %v1026_v3 = vpop.f32.mrf.mxu1  ;;  %v1534_v47 = vadd.f32 %v1491_v12, %v1391_v9  ;;  %v4082_v12 = vld [vmem:[#allocation25_spill] sm:$0xff] }
 0x1c0   : > { %v1027_v37 = vadd.f32 %v1026_v3, %v4077_v63 }
 0x1c1   : > { %v1351_v59 = vpop.f32.mrf.mxu2  ;;  %v3689_v10 = vadd.f32 %v1650_v5, %v1534_v47  ;;  %v4081_v5 = vld [vmem:[#allocation28_spill] sm:$0xff] }
 0x1c2   : > { %v1392_v42 = vadd.f32 %v1351_v59, %v1025_v34 }
 0x1c3   : > { %2673 = vmatmul.msk.bf16.gmra.mxu3 %vm674_vm4, %v4075_v45 }
 0x1c5   : > { %v1653_v8 = vpop.f32.mrf.mxu0 }
 0x1c6   : > { %v1494_v57 = vpop.f32.mrf.mxu3 }
 0x1c7   : > { %v1029_v50 = vpop.f32.mrf.mxu1  ;;  %v1535_v21 = vadd.f32 %v1494_v57, %v1392_v42 }
 0x1c8   : > { %2690 = vmatmul.msk.bf16.gmra.mxu0 %vm674_vm4, %v4076_v20  ;;  %v1030_v11 = vadd.f32 %v1029_v50, %v4079_v51 }
 0x1c9   : > { %v1353_v19 = vpop.f32.mrf.mxu2  ;;  %v3698_v30 = vadd.f32 %v1653_v8, %v1535_v21  ;;  %v4083_v8 = vld [vmem:[#allocation27_spill] sm:$0xff] }
 0x1ca   : > { %2638 = vmatmul.msk.bf16.gmra.mxu1 %vm674_vm4, %v4076_v20  ;;  %v1393_v58 = vadd.f32 %v1353_v19, %v1027_v37 }
 0x1cd   : > { %v1655_v43 = vpop.f32.mrf.mxu0 }
 0x1ce   : > { %v1496_v38 = vpop.f32.mrf.mxu3  ;;  %2658 = vmatmul.msk.bf16.gmra.mxu2 %vm674_vm4, %v4078_v7 }
 0x1cf   : > { %v1031_v14 = vpop.f32.mrf.mxu1  ;;  %v1536_v32 = vadd.f32 %v1496_v38, %v1393_v58 }
 0x1d0   : > { %v1032_v23 = vadd.f32 %v1031_v14, %v4082_v12  ;;  %v3738_v12 = vld [vmem:[%s3960_s2] ss:$0 sm:$0xff] }
 0x1d1   : > { %v1356_v26 = vpop.f32.mrf.mxu2  ;;  %v3703_v40 = vadd.f32 %v1655_v43, %v1536_v32  ;;  %v4084_v43 = vld [vmem:[#allocation29_spill] sm:$0xff] }
 0x1d2   : > { %v1394_v60 = vadd.f32 %v1356_v26, %v1030_v11 }
 0x1d3   : > { %2674 = vmatmul.msk.bf16.gmra.mxu3 %vm674_vm4, %v4080_v36 }
 0x1d5   : > { %v1658_v52 = vpop.f32.mrf.mxu0 }
 0x1d6   : > { %v1499_v54 = vpop.f32.mrf.mxu3 }
 0x1d7   : > { %v1034_v27 = vpop.f32.mrf.mxu1  ;;  %v1537_v9 = vadd.f32 %v1499_v54, %v1394_v60 }
 0x1d8   : > { %2691 = vmatmul.msk.bf16.gmra.mxu0 %vm674_vm4, %v4081_v5  ;;  %v1035_v57 = vadd.f32 %v1034_v27, %v4083_v8  ;;  %v4087_v8 = vld [vmem:[#allocation12_spill] sm:$0xff] }
 0x1d9   : > { %v1358_v3 = vpop.f32.mrf.mxu2  ;;  %v3712_v47 = vadd.f32 %v1658_v52, %v1537_v9  ;;  %v4085_v52 = vld [vmem:[#allocation9_spill] sm:$0xff] }
 0x1da   : > { %2639 = vmatmul.msk.bf16.gmra.mxu1 %vm674_vm4, %v4081_v5  ;;  %v1395_v44 = vadd.f32 %v1358_v3, %v1032_v23 }
 0x1dd   : > { %v1660_v34 = vpop.f32.mrf.mxu0 }
 0x1de   : > { %v1501_v59 = vpop.f32.mrf.mxu3  ;;  %2659 = vmatmul.msk.bf16.gmra.mxu2 %vm674_vm4, %v3405_v4 }
 0x1df   : > { %v1036_v42 = vpop.f32.mrf.mxu1  ;;  %v1538_v45 = vadd.f32 %v1501_v59, %v1395_v44 }
 0x1e0   : > { %v1037_v4 = vadd.f32 %v1036_v42, %v4084_v43 }
 0x1e1   : > { %v1361_v50 = vpop.f32.mrf.mxu2  ;;  %v3717_v21 = vadd.f32 %v1660_v34, %v1538_v45 }
 0x1e2   : > { %v1396_v20 = vadd.f32 %v1361_v50, %v1035_v57 }
 0x1e3   : > { %2675 = vmatmul.msk.bf16.gmra.mxu3 %vm674_vm4, %v2953_v29 }
 0x1e5   : > { %v1663_v63 = vpop.f32.mrf.mxu0 }
 0x1e6   : > { %v1504_v37 = vpop.f32.mrf.mxu3 }
 0x1e7   : > { %v1741_v19 = vpop.f32.mrf.mxu1  ;;  %v1539_v58 = vadd.f32 %v1504_v37, %v1396_v20  ;;  %v4088_v20 = vld [vmem:[#allocation30_spill] sm:$0xff] }
 0x1e8   : > { %2692 = vmatmul.msk.bf16.gmra.mxu0 %vm674_vm4, %v3422_v17  ;;  %v1821_v26 = vadd.f32 %v1741_v19, %v3420_v33 }
 0x1e9   : > { %v1363_v38 = vpop.f32.mrf.mxu2  ;;  %v3726_v7 = vadd.f32 %v1663_v63, %v1539_v58  ;;  %v4089_v58 = vld [vmem:[#allocation18_spill] sm:$0xff] }
 0x1ea   : > { %2640 = vmatmul.msk.bf16.gmra.mxu1 %vm674_vm4, %v3422_v17  ;;  %v1397_v14 = vadd.f32 %v1363_v38, %v1037_v4 }
 0x1ed   : > { %v1665_v32 = vpop.f32.mrf.mxu0 }
 0x1ee   : > { %v1506_v51 = vpop.f32.mrf.mxu3  ;;  %2660 = vmatmul.msk.bf16.gmra.mxu2 %vm674_vm4, %v3429_v62  ;;  %v4086_v62 = vld [vmem:[#allocation4_spill] sm:$0xff] }
 0x1ef   : > { %v1743_v29 = vpop.f32.mrf.mxu1  ;;  %v1540_v11 = vadd.f32 %v1506_v51, %v1397_v14 }
 0x1f0   : > { %v1822_v23 = vadd.f32 %v1743_v29, %v4086_v62  ;;  %v4090_v29 = vld [vmem:[#allocation31_spill] sm:$0xff] }
 0x1f1   : > { %v1878_v60 = vpop.f32.mrf.mxu2  ;;  %v3731_v36 = vadd.f32 %v1665_v32, %v1540_v11 }
 0x1f2   : > { %v1958_v17 = vadd.f32 %v1878_v60, %v1821_v26  ;;  %v4091_v26 = vld [vmem:[#allocation13_spill] sm:$0xff] }
 0x1f3   : > { %2676 = vmatmul.msk.bf16.gmra.mxu3 %vm674_vm4, %v4085_v52 }
 0x1f5   : > { %v2183_v54 = vpop.f32.mrf.mxu0 }
 0x1f6   : > { %v2044_v27 = vpop.f32.mrf.mxu3 }
 0x1f7   : > { %v1746_v9 = vpop.f32.mrf.mxu1  ;;  %v2124_v5 = vadd.f32 %v2044_v27, %v1958_v17 }
 0x1f8   : > { %2693 = vmatmul.msk.bf16.gmra.mxu0 %vm674_vm4, %v3448_v53  ;;  %v1823_v63 = vadd.f32 %v1746_v9, %v4088_v20 }
 0x1f9   : > { %v2263_v33 = vadd.f32 %v2183_v54, %v2124_v5  ;;  %v1880_v3 = vpop.f32.mrf.mxu2 }
 0x1fa   : > { %2641 = vmatmul.msk.bf16.gmra.mxu1 %vm674_vm4, %v3448_v53  ;;  %v1959_v34 = vadd.f32 %v1880_v3, %v1822_v23 }
 0x1fb   : > { %v2299_v44 = vadd.f32 %v3738_v12, %v2263_v33  ;;  %v4092_v33 = vld [vmem:[#allocation32_spill] sm:$0xff] }
 0x1fd   : > { %v2331_v59 = vpack.c.bf16 %v2299_v44, %v2299_v44  ;;  %v2185_v42 = vpop.f32.mrf.mxu0  ;;  %v4093_v44 = vld [vmem:[#allocation10_spill] sm:$0xff] }
 0x1fe   : > { %v2046_v45 = vpop.f32.mrf.mxu3  ;;  %2661 = vmatmul.msk.bf16.gmra.mxu2 %vm674_vm4, %v4087_v8 }
 0x1ff   : > { %v1748_v57 = vpop.f32.mrf.mxu1  ;;  %2364 = vst.msk [vmem:[%s3750_s20] sm:$0xf] %vm2363_vm9, %v2331_v59  ;;  %v2125_v53 = vadd.f32 %v2046_v45, %v1959_v34  ;;  %v4094_v45 = vld [vmem:[#allocation3_spill] sm:$0xff] }
 0x200   : > { %v1824_v60 = vadd.f32 %v1748_v57, %v4091_v26 }
 0x201   : > { %v2264_v50 = vadd.f32 %v2185_v42, %v2125_v53  ;;  %v1883_v37 = vpop.f32.mrf.mxu2 }
 0x202   : > { %v1960_v43 = vadd.f32 %v1883_v37, %v1823_v63  ;;  %v4095_v37 = vld [vmem:[#allocation35_spill] sm:$0xff] }
 0x203   : > { %v2300_v19 = vadd.f32 %v3738_v12, %v2264_v50  ;;  %2677 = vmatmul.msk.bf16.gmra.mxu3 %vm674_vm4, %v4089_v58  ;;  %v4096_v58 = vld [vmem:[#allocation33_spill] sm:$0xff] }
 0x205   : > { %v2332_v4 = vpack.c.bf16 %v2300_v19, %v2300_v19  ;;  %v2188_v38 = vpop.f32.mrf.mxu0 }
 0x206   : > { %v2049_v14 = vpop.f32.mrf.mxu3 }
 0x207   : > { %v1751_v32 = vpop.f32.mrf.mxu1  ;;  %2365 = vst.msk [vmem:[%s3750_s20 + $0x4] sm:$0xf] %vm2363_vm9, %v2332_v4  ;;  %v2126_v51 = vadd.f32 %v2049_v14, %v1960_v43 }
 0x208   : > { %2694 = vmatmul.msk.bf16.gmra.mxu0 %vm674_vm4, %v4090_v29  ;;  %v1825_v34 = vadd.f32 %v1751_v32, %v4093_v44 }
 0x209   : > { %v2265_v11 = vadd.f32 %v2188_v38, %v2126_v51  ;;  %v1885_v52 = vpop.f32.mrf.mxu2 }
 0x20a   : > { %2642 = vmatmul.msk.bf16.gmra.mxu1 %vm674_vm4, %v4090_v29  ;;  %v1961_v54 = vadd.f32 %v1885_v52, %v1824_v60 }
 0x20b   : > { %v2301_v17 = vadd.f32 %v3738_v12, %v2265_v11  ;;  %v4097_v11 = vld [vmem:[#allocation36_spill] sm:$0xff] }
 0x20d   : > { %v2333_v27 = vpack.c.bf16 %v2301_v17, %v2301_v17  ;;  %v2190_v9 = vpop.f32.mrf.mxu0  ;;  %v4098_v17 = vld [vmem:[#allocation34_spill] sm:$0xff] }
 0x20e   : > { %v2051_v5 = vpop.f32.mrf.mxu3  ;;  %2662 = vmatmul.msk.bf16.gmra.mxu2 %vm674_vm4, %v4092_v33 }
 0x20f   : > { %v1753_v62 = vpop.f32.mrf.mxu1  ;;  %2366 = vst.msk [vmem:[%s3750_s20 + $0x8] sm:$0xf] %vm2363_vm9, %v2333_v27  ;;  %v2127_v23 = vadd.f32 %v2051_v5, %v1961_v54  ;;  %v4099_v5 = vld [vmem:[#allocation5_spill] sm:$0xff] }
 0x210   : > { %v1826_v43 = vadd.f32 %v1753_v62, %v4096_v58 }
 0x211   : > { %v2266_v3 = vadd.f32 %v2190_v9, %v2127_v23  ;;  %v1888_v59 = vpop.f32.mrf.mxu2 }
 0x212   : > { %v1962_v8 = vadd.f32 %v1888_v59, %v1825_v34  ;;  %v4100_v59 = vld [vmem:[#allocation39_spill] sm:$0xff] }
 0x213   : > { %v2302_v42 = vadd.f32 %v3738_v12, %v2266_v3  ;;  %2678 = vmatmul.msk.bf16.gmra.mxu3 %vm674_vm4, %v4094_v45  ;;  %v4101_v45 = vld [vmem:[#allocation37_spill] sm:$0xff] }
 0x215   : > { %v2334_v57 = vpack.c.bf16 %v2302_v42, %v2302_v42  ;;  %v2193_v53 = vpop.f32.mrf.mxu0 }
 0x216   : > { %v2054_v50 = vpop.f32.mrf.mxu3 }
 0x217   : > { %v1756_v20 = vpop.f32.mrf.mxu1  ;;  %2367 = vst.msk [vmem:[%s3750_s20 + $0xc] sm:$0xf] %vm2363_vm9, %v2334_v57  ;;  %v2128_v63 = vadd.f32 %v2054_v50, %v1962_v8 }
 0x218   : > { %2695 = vmatmul.msk.bf16.gmra.mxu0 %vm674_vm4, %v4095_v37  ;;  %v1827_v54 = vadd.f32 %v1756_v20, %v4098_v17 }
 0x219   : > { %v2267_v19 = vadd.f32 %v2193_v53, %v2128_v63  ;;  %v1890_v4 = vpop.f32.mrf.mxu2 }
 0x21a   : > { %2643 = vmatmul.msk.bf16.gmra.mxu1 %vm674_vm4, %v4095_v37  ;;  %v1963_v14 = vadd.f32 %v1890_v4, %v1826_v43 }
 0x21b   : > { %v2303_v38 = vadd.f32 %v3738_v12, %v2267_v19  ;;  %v4102_v19 = vld [vmem:[#allocation7_spill] sm:$0xff] }
 0x21d   : > { %v2335_v32 = vpack.c.bf16 %v2303_v38, %v2303_v38  ;;  %v2195_v51 = vpop.f32.mrf.mxu0  ;;  %v4103_v38 = vld [vmem:[#allocation38_spill] sm:$0xff] }
 0x21e   : > { %v2056_v29 = vpop.f32.mrf.mxu3  ;;  %2663 = vmatmul.msk.bf16.gmra.mxu2 %vm674_vm4, %v4097_v11 }
 0x21f   : > { %v1758_v26 = vpop.f32.mrf.mxu1  ;;  %2368 = vst.msk [vmem:[%s3750_s20 + $0x10] sm:$0xf] %vm2363_vm9, %v2335_v32  ;;  %v2129_v60 = vadd.f32 %v2056_v29, %v1963_v14  ;;  %v4104_v29 = vld [vmem:[#allocation11_spill] sm:$0xff] }
 0x220   : > { %v1828_v8 = vadd.f32 %v1758_v26, %v4101_v45 }
 0x221   : > { %v2268_v52 = vadd.f32 %v2195_v51, %v2129_v60  ;;  %v1893_v27 = vpop.f32.mrf.mxu2 }
 0x222   : > { %v1964_v33 = vadd.f32 %v1893_v27, %v1827_v54  ;;  %v4105_v27 = vld [vmem:[#allocation41_spill] sm:$0xff] }
 0x223   : > { %v2304_v9 = vadd.f32 %v3738_v12, %v2268_v52  ;;  %2679 = vmatmul.msk.bf16.gmra.mxu3 %vm674_vm4, %v4099_v5  ;;  %v4106_v5 = vld [vmem:[#allocation8_spill] sm:$0xff] }
 0x225   : > { %v2336_v62 = vpack.c.bf16 %v2304_v9, %v2304_v9  ;;  %v2198_v23 = vpop.f32.mrf.mxu0 }
 0x226   : > { %v2059_v3 = vpop.f32.mrf.mxu3 }
 0x227   : > { %v1761_v44 = vpop.f32.mrf.mxu1  ;;  %2369 = vst.msk [vmem:[%s3750_s20 + $0x14] sm:$0xf] %vm2363_vm9, %v2336_v62  ;;  %v2130_v34 = vadd.f32 %v2059_v3, %v1964_v33 }
 0x228   : > { %2696 = vmatmul.msk.bf16.gmra.mxu0 %vm674_vm4, %v4100_v59  ;;  %v1829_v14 = vadd.f32 %v1761_v44, %v4103_v38 }
 0x229   : > { %v2269_v42 = vadd.f32 %v2198_v23, %v2130_v34  ;;  %v1895_v57 = vpop.f32.mrf.mxu2 }
 0x22a   : > { %2644 = vmatmul.msk.bf16.gmra.mxu1 %vm674_vm4, %v4100_v59  ;;  %v1965_v50 = vadd.f32 %v1895_v57, %v1828_v8  ;;  %v4107_v57 = vld [vmem:[#allocation40_spill] sm:$0xff] }
 0x22b   : > { %v2305_v53 = vadd.f32 %v3738_v12, %v2269_v42 }
 0x22d   : > { %v2337_v20 = vpack.c.bf16 %v2305_v53, %v2305_v53  ;;  %v2200_v63 = vpop.f32.mrf.mxu0 }
 0x22e   : > { %v2061_v37 = vpop.f32.mrf.mxu3  ;;  %2664 = vmatmul.msk.bf16.gmra.mxu2 %vm674_vm4, %v4102_v19 }
 0x22f   : > { %v1763_v58 = vpop.f32.mrf.mxu1  ;;  %2370 = vst.msk [vmem:[%s3750_s20 + $0x18] sm:$0xf] %vm2363_vm9, %v2337_v20  ;;  %v2131_v43 = vadd.f32 %v2061_v37, %v1965_v50 }
 0x230   : > { %v1830_v33 = vadd.f32 %v1763_v58, %v4106_v5  ;;  %v4108_v58 = vld [vmem:[#allocation42_spill] sm:$0xff] }
 0x231   : > { %v2270_v4 = vadd.f32 %v2200_v63, %v2131_v43  ;;  %v1898_v32 = vpop.f32.mrf.mxu2  ;;  %v1703_v43 = vrot.slane %v4108_v58, 5 }
 0x232   : > { %v1966_v11 = vadd.f32 %v1898_v32, %v1829_v14 }
 0x233   : > { %v2306_v51 = vadd.f32 %v3738_v12, %v2270_v4  ;;  %2680 = vmatmul.msk.bf16.gmra.mxu3 %vm674_vm4, %v4104_v29  ;;  %v3829_v4 = vld [vmem:[%s2807_s27 + $0xd0] sm:$0xf] }
 0x235   : > { %v2338_v26 = vpack.c.bf16 %v2306_v51, %v2306_v51  ;;  %v2203_v60 = vpop.f32.mrf.mxu0  ;;  %v4109_v51 = vld [vmem:[#allocation6_spill] sm:$0xff] }
 0x236   : > { %v2064_v52 = vpop.f32.mrf.mxu3  ;;  %v2627_v29 = vrot.slane %v4109_v51, 9 }
 0x237   : > { %v1766_v17 = vpop.f32.mrf.mxu1  ;;  %2371 = vst.msk [vmem:[%s3750_s20 + $0x1c] sm:$0xf] %vm2363_vm9, %v2338_v26  ;;  %v2132_v54 = vadd.f32 %v2064_v52, %v1966_v11  ;;  %v2000_v26 = vshll.u32 %v3829_v4, 16 }
 0x238   : > { %2697 = vmatmul.msk.bf16.gmra.mxu0 %vm674_vm4, %v4105_v27  ;;  %v1831_v53 = vadd.f32 %v1766_v17, %v4107_v57 }
 0x239   : > { %v2271_v9 = vadd.f32 %v2203_v60, %v2132_v54  ;;  %v1900_v62 = vpop.f32.mrf.mxu2  ;;  %v2004_v60 = vshrl.u32 %v3829_v4, 16 }
 0x23a   : > { %2645 = vmatmul.msk.bf16.gmra.mxu1 %vm674_vm4, %v4105_v27  ;;  %v1967_v3 = vadd.f32 %v1900_v62, %v1830_v33  ;;  %v1705_v27 = vrot.slane %v1703_v43, 4  ;;  %v1704_v62 = vsel %vm3151_vm8, %v2627_v29, %v1703_v43 }
 0x23b   : > { %v2307_v23 = vadd.f32 %v3738_v12, %v2271_v9  ;;  %v1706_v9 = vrot.slane %v3575_v13, 5  ;;  %v1710_v57 = vunpack.c.l.b16 %v1704_v62 }
 0x23d   : > { %v2339_v44 = vpack.c.bf16 %v2307_v23, %v2307_v23  ;;  %v2205_v34 = vpop.f32.mrf.mxu0 }
 0x23e   : > { %v2066_v59 = vpop.f32.mrf.mxu3  ;;  %2665 = vmatmul.msk.bf16.gmra.mxu2 %vm674_vm4, %v3568_v0  ;;  %v3826_v0 = vld [vmem:[%s2807_s27 + $0xcc] sm:$0xf] }
 0x23f   : > { %v1768_v42 = vpop.f32.mrf.mxu1  ;;  %2372 = vst.msk [vmem:[%s3750_s20 + $0x20] sm:$0xf] %vm2363_vm9, %v2339_v44  ;;  %v2133_v45 = vadd.f32 %v2066_v59, %v1967_v3  ;;  %v1994_v11 = vshll.u32 %v3826_v0, 16  ;;  %v2002_v44 = vrot.slane %v2000_v26, 5  ;;  %v2159_v26 = vrot.slane %v3829_v4, 5 }
 0x240   : > { %v1832_v17 = vadd.f32 %v1768_v42, %v3572_v15  ;;  %v1707_v42 = vsel %vm3151_vm8, %v1705_v27, %v1706_v9 }
 0x241   : > { %v2272_v8 = vadd.f32 %v2205_v34, %v2133_v45  ;;  %v1903_v50 = vpop.f32.mrf.mxu2  ;;  %v1996_v3 = vrot.slane %v1994_v11, 5  ;;  %v2006_v34 = vrot.slane %v2004_v60, 4  ;;  %v2161_v4 = vrot.slane %v2159_v26, 4 }
 0x242   : > { %v1968_v63 = vadd.f32 %v1903_v50, %v1831_v53  ;;  %v1711_v53 = vunpack.c.l.b16 %v1707_v42 }
 0x243   : > { %v2308_v20 = vadd.f32 %v3738_v12, %v2272_v8  ;;  %2681 = vmatmul.msk.bf16.gmra.mxu3 %vm674_vm4, %v3157_v56  ;;  %v1991_v56 = vshrl.u32 %v3826_v0, 16 }
 0x245   : > { %v2340_v37 = vpack.c.bf16 %v2308_v20, %v2308_v20  ;;  %v2208_v19 = vpop.f32.mrf.mxu0  ;;  %v1993_v23 = vrot.slane %v1991_v56, 4  ;;  %v2007_v20 = vor.u32 %v2006_v34, %v2002_v44 }
 0x246   : > { %v2069_v38 = vpop.f32.mrf.mxu3 }
 0x247   : > { %v1771_v14 = vpop.f32.mrf.mxu1  ;;  %2373 = vst.msk [vmem:[%s3750_s20 + $0x24] sm:$0xf] %vm2363_vm9, %v2340_v37  ;;  %v2134_v32 = vadd.f32 %v2069_v38, %v1968_v63  ;;  %v1997_v50 = vor.u32 %v1996_v3, %v1993_v23  ;;  %v1712_v38 = vpack.c.b16 %v1711_v53, %v1710_v57  ;;  %v2008_v51 = vrot.slane %v2007_v20, 4 }
 0x248   : > { %2698 = vmatmul.msk.bf16.gmra.mxu0 %vm674_vm4, %v3591_v16 }
 0x249   : > { %v2273_v52 = vadd.f32 %v2208_v19, %v2134_v32  ;;  %v1905_v54 = vpop.f32.mrf.mxu2  ;;  %v1833_v19 = vadd.f32 %v1771_v14, %v3589_v18  ;;  %v1998_v32 = vrot.slane %v1997_v50, 4 }
 0x24a   : > { %2646 = vmatmul.msk.bf16.gmra.mxu1 %vm674_vm4, %v3591_v16  ;;  %v1969_v33 = vadd.f32 %v1905_v54, %v1832_v17  ;;  %v225_v16 = vld [vmem:[%s2807_s27 + $0xd4] sm:$0x1]  ;;  %v2684_v17 = vrot.slane %v3826_v0, 9 }
 0x24b   : > { %v2309_v5 = vadd.f32 %v3738_v12, %v2273_v52  ;;  %v2010_v63 = vshll.u32 %v225_v16, 16 }
 0x24c   : > { %v2160_v0 = vsel %vm3151_vm8, %v2684_v17, %v2159_v26 }
 0x24d   : > { %v2341_v59 = vpack.c.bf16 %v2309_v5, %v2309_v5  ;;  %v2210_v15 = vpop.f32.mrf.mxu0  ;;  %v2012_v29 = vrot.slane %v2010_v63, 5  ;;  %v2162_v5 = vrot.slane %v225_v16, 5 }
 0x24e   : > { %v2071_v45 = vpop.f32.mrf.mxu3  ;;  %2666 = vmatmul.msk.bf16.gmra.mxu2 %vm674_vm4, %v3600_v1 }
 0x24f   : > { %v1773_v13 = vpop.f32.mrf.mxu1  ;;  %2374 = vst.msk [vmem:[%s3750_s20 + $0x28] sm:$0xf] %vm2363_vm9, %v2341_v59  ;;  %v2135_v8 = vadd.f32 %v2071_v45, %v1969_v33  ;;  %v2013_v14 = vsel %vm2838_vm5, %v2008_v51, %v2012_v29  ;;  %v2721_v33 = vld [vmem:[%s2807_s27 + $0xcc] sm:$0xff]  ;;  %v2165_v45 = vunpack.c.l.b16 %v2160_v0 }
 0x250   : > { %v1834_v27 = vadd.f32 %v1773_v13, %v3603_v35  ;;  %v2163_v35 = vsel %vm3151_vm8, %v2161_v4, %v2162_v5 }
 0x251   : > { %v2274_v37 = vadd.f32 %v2210_v15, %v2135_v8  ;;  %v1908_v58 = vpop.f32.mrf.mxu2  ;;  %v2166_v13 = vunpack.c.l.b16 %v2163_v35 }
 0x252   : > { %v1970_v1 = vadd.f32 %v1908_v58, %v1833_v19 }
 0x253   : > { %v2310_v43 = vadd.f32 %v3738_v12, %v2274_v37  ;;  %2682 = vmatmul.msk.bf16.gmra.mxu3 %vm674_vm4, %v3607_v31  ;;  %v2003_v31 = vsel %vm2838_vm5, %v1998_v32, %v2002_v44  ;;  %v2016_v44 = vunpack.c.l.b16 %v2013_v14  ;;  %v2167_v20 = vpack.c.b16 %v2166_v13, %v2165_v45 }
 0x254   : > { %v2015_v3 = vunpack.c.l.b16 %v2003_v31 }
 0x255   : > { %v2342_v56 = vpack.c.bf16 %v2310_v43, %v2310_v43  ;;  %v2213_v11 = vpop.f32.mrf.mxu0 }
 0x256   : > { %v2074_v60 = vpop.f32.mrf.mxu3  ;;  %v2017_v16 = vpack.c.b16 %v2016_v44, %v2015_v3 }
 0x257   : > { %v1776_v52 = vpop.f32.mrf.mxu1  ;;  %2375 = vst.msk [vmem:[%s3750_s20 + $0x2c] sm:$0xf] %vm2363_vm9, %v2342_v56  ;;  %v2136_v18 = vadd.f32 %v2074_v60, %v1970_v1 }
 0x258   : > { %2699 = vmatmul.msk.bf16.gmra.mxu0 %vm674_vm4, %v1712_v38  ;;  %v1835_v57 = vadd.f32 %v1776_v52, %v3614_v55 }
 0x259   : > { %v2275_v54 = vadd.f32 %v2213_v11, %v2136_v18  ;;  %v1910_v9 = vpop.f32.mrf.mxu2 }
 0x25a   : > { %2647 = vmatmul.msk.bf16.gmra.mxu1 %vm674_vm4, %v1712_v38  ;;  %v1971_v23 = vadd.f32 %v1910_v9, %v1834_v27 }
 0x25b   : > { %v2311_v62 = vadd.f32 %v3738_v12, %v2275_v54 }
 0x25d   : > { %v2343_v34 = vpack.c.bf16 %v2311_v62, %v2311_v62  ;;  %v2215_v46 = vpop.f32.mrf.mxu0 }
 0x25e   : > { %v2076_v59 = vpop.f32.mrf.mxu3  ;;  %2667 = vmatmul.msk.bf16.gmra.mxu2 %vm674_vm4, %v2721_v33 }
 0x25f   : > { %v1778_v15 = vpop.f32.mrf.mxu1  ;;  %2376 = vst.msk [vmem:[%s3750_s20 + $0x30] sm:$0xf] %vm2363_vm9, %v2343_v34  ;;  %v2137_v42 = vadd.f32 %v2076_v59, %v1971_v23 }
 0x260   : > { %v1836_v55 = vadd.f32 %v1778_v15, %v3619_v49 }
 0x261   : > { %v2276_v8 = vadd.f32 %v2215_v46, %v2137_v42  ;;  %v1913_v53 = vpop.f32.mrf.mxu2 }
 0x262   : > { %v1972_v61 = vadd.f32 %v1913_v53, %v1835_v57 }
 0x263   : > { %v2312_v50 = vadd.f32 %v3738_v12, %v2276_v8  ;;  %2683 = vmatmul.msk.bf16.gmra.mxu3 %vm674_vm4, %v2017_v16 }
 0x265   : > { %v2344_v63 = vpack.c.bf16 %v2312_v50, %v2312_v50  ;;  %v2218_v37 = vpop.f32.mrf.mxu0 }
 0x266   : > { %v2079_v19 = vpop.f32.mrf.mxu3 }
 0x267   : > { %v1781_v58 = vpop.f32.mrf.mxu1  ;;  %2377 = vst.msk [vmem:[%s3750_s20 + $0x34] sm:$0xf] %vm2363_vm9, %v2344_v63  ;;  %v2138_v43 = vadd.f32 %v2079_v19, %v1972_v61 }
 0x268   : > { %2700 = vmatmul.msk.bf16.gmra.mxu0 %vm674_vm4, %v2167_v20  ;;  %v1837_v18 = vadd.f32 %v1781_v58, %v3628_v2 }
 0x269   : > { %v2277_v1 = vadd.f32 %v2218_v37, %v2138_v43  ;;  %v1915_v38 = vpop.f32.mrf.mxu2 }
 0x26a   : > { %v1973_v51 = vadd.f32 %v1915_v38, %v1836_v55 }
 0x26b   : > { %v2313_v32 = vadd.f32 %v3738_v12, %v2277_v1 }
 0x26d   : > { %v2345_v29 = vpack.c.bf16 %v2313_v32, %v2313_v32  ;;  %v2220_v56 = vpop.f32.mrf.mxu0 }
 0x26e   : > { %v2081_v11 = vpop.f32.mrf.mxu3 }
 0x26f   : > { %v1783_v26 = vpop.f32.mrf.mxu1  ;;  %2378 = vst.msk [vmem:[%s3750_s20 + $0x38] sm:$0xf] %vm2363_vm9, %v2345_v29  ;;  %v2139_v60 = vadd.f32 %v2081_v11, %v1973_v51 }
 0x270   : > { %v1838_v33 = vadd.f32 %v1783_v26, %v3633_v39 }
 0x271   : > { %v2278_v52 = vadd.f32 %v2220_v56, %v2139_v60  ;;  %v1918_v31 = vpop.f32.mrf.mxu2 }
 0x272   : > { %v1974_v17 = vadd.f32 %v1918_v31, %v1837_v18 }
 0x273   : > { %v2314_v14 = vadd.f32 %v3738_v12, %v2278_v52 }
 0x275   : > { %v2346_v49 = vpack.c.bf16 %v2314_v14, %v2314_v14  ;;  %v2223_v54 = vpop.f32.mrf.mxu0 }
 0x276   : > { %v2084_v27 = vpop.f32.mrf.mxu3 }
 0x277   : > { %v1786_v9 = vpop.f32.mrf.mxu1  ;;  %2379 = vst.msk [vmem:[%s3750_s20 + $0x3c] sm:$0xf] %vm2363_vm9, %v2346_v49  ;;  %v2140_v4 = vadd.f32 %v2084_v27, %v1974_v17 }
 0x278   : > { %v1839_v59 = vadd.f32 %v1786_v9, %v3642_v41 }
 0x279   : > { %v2279_v5 = vadd.f32 %v2223_v54, %v2140_v4  ;;  %v1920_v62 = vpop.f32.mrf.mxu2 }
 0x27a   : > { %v1975_v3 = vadd.f32 %v1920_v62, %v1838_v33 }
 0x27b   : > { %v2315_v23 = vadd.f32 %v3738_v12, %v2279_v5 }
 0x27d   : > { %v2347_v2 = vpack.c.bf16 %v2315_v23, %v2315_v23  ;;  %v2225_v44 = vpop.f32.mrf.mxu0 }
 0x27e   : > { %v2086_v34 = vpop.f32.mrf.mxu3 }
 0x27f   : > { %v1788_v46 = vpop.f32.mrf.mxu1  ;;  %2380 = vst.msk [vmem:[%s3750_s20 + $0x40] sm:$0xf] %vm2363_vm9, %v2347_v2  ;;  %v2141_v0 = vadd.f32 %v2086_v34, %v1975_v3 }
 0x280   : > { %v1840_v50 = vadd.f32 %v1788_v46, %v3647_v28 }
 0x281   : > { %v2280_v35 = vadd.f32 %v2225_v44, %v2141_v0  ;;  %v1923_v15 = vpop.f32.mrf.mxu2 }
 0x282   : > { %v1976_v16 = vadd.f32 %v1923_v15, %v1839_v59 }
 0x283   : > { %v2316_v42 = vadd.f32 %v3738_v12, %v2280_v35 }
 0x285   : > { %v2348_v39 = vpack.c.bf16 %v2316_v42, %v2316_v42  ;;  %v2228_v45 = vpop.f32.mrf.mxu0 }
 0x286   : > { %v2089_v13 = vpop.f32.mrf.mxu3 }
 0x287   : > { %v1791_v8 = vpop.f32.mrf.mxu1  ;;  %2381 = vst.msk [vmem:[%s3750_s20 + $0x44] sm:$0xf] %vm2363_vm9, %v2348_v39  ;;  %v2142_v57 = vadd.f32 %v2089_v13, %v1976_v16 }
 0x288   : > { %v1841_v55 = vadd.f32 %v1791_v8, %v3656_v48 }
 0x289   : > { %v2281_v53 = vadd.f32 %v2228_v45, %v2142_v57  ;;  %v1925_v61 = vpop.f32.mrf.mxu2 }
 0x28a   : > { %v1977_v63 = vadd.f32 %v1925_v61, %v1840_v50 }
 0x28b   : > { %v2317_v20 = vadd.f32 %v3738_v12, %v2281_v53 }
 0x28d   : > { %v2349_v41 = vpack.c.bf16 %v2317_v20, %v2317_v20  ;;  %v2230_v37 = vpop.f32.mrf.mxu0 }
 0x28e   : > { %v2091_v19 = vpop.f32.mrf.mxu3 }
 0x28f   : > { %v1793_v58 = vpop.f32.mrf.mxu1  ;;  %2382 = vst.msk [vmem:[%s3750_s20 + $0x48] sm:$0xf] %vm2363_vm9, %v2349_v41  ;;  %v2143_v43 = vadd.f32 %v2091_v19, %v1977_v63 }
 0x290   : > { %v1842_v52 = vadd.f32 %v1793_v58, %v3661_v24 }
 0x291   : > { %v2282_v1 = vadd.f32 %v2230_v37, %v2143_v43  ;;  %v1928_v38 = vpop.f32.mrf.mxu2 }
 0x292   : > { %v1978_v51 = vadd.f32 %v1928_v38, %v1841_v55 }
 0x293   : > { %v2318_v32 = vadd.f32 %v3738_v12, %v2282_v1 }
 0x295   : > { %v2350_v28 = vpack.c.bf16 %v2318_v32, %v2318_v32  ;;  %v2233_v29 = vpop.f32.mrf.mxu0 }
 0x296   : > { %v2094_v56 = vpop.f32.mrf.mxu3 }
 0x297   : > { %v1796_v11 = vpop.f32.mrf.mxu1  ;;  %2383 = vst.msk [vmem:[%s3750_s20 + $0x4c] sm:$0xf] %vm2363_vm9, %v2350_v28  ;;  %v2144_v26 = vadd.f32 %v2094_v56, %v1978_v51 }
 0x298   : > { %v1843_v4 = vadd.f32 %v1796_v11, %v3670_v22 }
 0x299   : > { %v2283_v60 = vadd.f32 %v2233_v29, %v2144_v26  ;;  %v1930_v18 = vpop.f32.mrf.mxu2 }
 0x29a   : > { %v1979_v14 = vadd.f32 %v1930_v18, %v1842_v52 }
 0x29b   : > { %v2319_v31 = vadd.f32 %v3738_v12, %v2283_v60 }
 0x29d   : > { %v2351_v48 = vpack.c.bf16 %v2319_v31, %v2319_v31  ;;  %v2235_v17 = vpop.f32.mrf.mxu0 }
 0x29e   : > { %v2096_v49 = vpop.f32.mrf.mxu3 }
 0x29f   : > { %v1798_v54 = vpop.f32.mrf.mxu1  ;;  %2384 = vst.msk [vmem:[%s3750_s20 + $0x50] sm:$0xf] %vm2363_vm9, %v2351_v48  ;;  %v2145_v27 = vadd.f32 %v2096_v49, %v1979_v14 }
 0x2a0   : > { %v1844_v46 = vadd.f32 %v1798_v54, %v3675_v25 }
 0x2a1   : > { %v2284_v9 = vadd.f32 %v2235_v17, %v2145_v27  ;;  %v1933_v5 = vpop.f32.mrf.mxu2 }
 0x2a2   : > { %v1980_v62 = vadd.f32 %v1933_v5, %v1843_v4 }
 0x2a3   : > { %v2320_v33 = vadd.f32 %v3738_v12, %v2284_v9 }
 0x2a5   : > { %v2352_v24 = vpack.c.bf16 %v2320_v33, %v2320_v33  ;;  %v2238_v23 = vpop.f32.mrf.mxu0 }
 0x2a6   : > { %v2099_v3 = vpop.f32.mrf.mxu3 }
 0x2a7   : > { %v1801_v2 = vpop.f32.mrf.mxu1  ;;  %2385 = vst.msk [vmem:[%s3750_s20 + $0x54] sm:$0xf] %vm2363_vm9, %v2352_v24  ;;  %v2146_v44 = vadd.f32 %v2099_v3, %v1980_v62 }
 0x2a8   : > { %v1845_v13 = vadd.f32 %v1801_v2, %v3684_v6 }
 0x2a9   : > { %v2285_v34 = vadd.f32 %v2238_v23, %v2146_v44  ;;  %v1935_v0 = vpop.f32.mrf.mxu2 }
 0x2aa   : > { %v1981_v59 = vadd.f32 %v1935_v0, %v1844_v46 }
 0x2ab   : > { %v2321_v35 = vadd.f32 %v3738_v12, %v2285_v34 }
 0x2ad   : > { %v2353_v22 = vpack.c.bf16 %v2321_v35, %v2321_v35  ;;  %v2240_v15 = vpop.f32.mrf.mxu0 }
 0x2ae   : > { %v2101_v42 = vpop.f32.mrf.mxu3 }
 0x2af   : > { %v1803_v16 = vpop.f32.mrf.mxu1  ;;  %2386 = vst.msk [vmem:[%s3750_s20 + $0x58] sm:$0xf] %vm2363_vm9, %v2353_v22  ;;  %v2147_v39 = vadd.f32 %v2101_v42, %v1981_v59 }
 0x2b0   : > { %v1846_v37 = vadd.f32 %v1803_v16, %v3689_v10 }
 0x2b1   : > { %v2286_v45 = vadd.f32 %v2240_v15, %v2147_v39  ;;  %v1938_v8 = vpop.f32.mrf.mxu2 }
 0x2b2   : > { %v1982_v53 = vadd.f32 %v1938_v8, %v1845_v13 }
 0x2b3   : > { %v2322_v57 = vadd.f32 %v3738_v12, %v2286_v45 }
 0x2b5   : > { %v2354_v25 = vpack.c.bf16 %v2322_v57, %v2322_v57  ;;  %v2243_v50 = vpop.f32.mrf.mxu0 }
 0x2b6   : > { %v2104_v61 = vpop.f32.mrf.mxu3 }
 0x2b7   : > { %v1806_v20 = vpop.f32.mrf.mxu1  ;;  %2387 = vst.msk [vmem:[%s3750_s20 + $0x5c] sm:$0xf] %vm2363_vm9, %v2354_v25  ;;  %v2148_v63 = vadd.f32 %v2104_v61, %v1982_v53 }
 0x2b8   : > { %v1847_v28 = vadd.f32 %v1806_v20, %v3698_v30 }
 0x2b9   : > { %v2287_v41 = vadd.f32 %v2243_v50, %v2148_v63  ;;  %v1940_v19 = vpop.f32.mrf.mxu2 }
 0x2ba   : > { %v1983_v6 = vadd.f32 %v1940_v19, %v1846_v37 }
 0x2bb   : > { %v2323_v58 = vadd.f32 %v3738_v12, %v2287_v41 }
 0x2bd   : > { %v2355_v43 = vpack.c.bf16 %v2323_v58, %v2323_v58  ;;  %v2245_v1 = vpop.f32.mrf.mxu0 }
 0x2be   : > { %v2106_v55 = vpop.f32.mrf.mxu3 }
 0x2bf   : > { %v1808_v38 = vpop.f32.mrf.mxu1  ;;  %2388 = vst.msk [vmem:[%s3750_s20 + $0x60] sm:$0xf] %vm2363_vm9, %v2355_v43  ;;  %v2149_v32 = vadd.f32 %v2106_v55, %v1983_v6 }
 0x2c0   : > { %v1848_v14 = vadd.f32 %v1808_v38, %v3703_v40 }
 0x2c1   : > { %v2288_v51 = vadd.f32 %v2245_v1, %v2149_v32  ;;  %v1943_v29 = vpop.f32.mrf.mxu2 }
 0x2c2   : > { %v1984_v10 = vadd.f32 %v1943_v29, %v1847_v28 }
 0x2c3   : > { %v2324_v56 = vadd.f32 %v3738_v12, %v2288_v51 }
 0x2c5   : > { %v2356_v11 = vpack.c.bf16 %v2324_v56, %v2324_v56  ;;  %v2248_v26 = vpop.f32.mrf.mxu0 }
 0x2c6   : > { %v2109_v60 = vpop.f32.mrf.mxu3 }
 0x2c7   : > { %2389 = vst.msk [vmem:[%s3750_s20 + $0x64] sm:$0xf] %vm2363_vm9, %v2356_v11  ;;  %v2150_v52 = vadd.f32 %v2109_v60, %v1984_v10  ;;  %v1811_v18 = vpop.f32.mrf.mxu1 }
 0x2c8   : > { %v1849_v5 = vadd.f32 %v1811_v18, %v3712_v47 }
 0x2c9   : > { %v2289_v31 = vadd.f32 %v2248_v26, %v2150_v52  ;;  %v1945_v48 = vpop.f32.mrf.mxu2 }
 0x2ca   : > { %v1985_v30 = vadd.f32 %v1945_v48, %v1848_v14 }
 0x2cb   : > { %v2325_v17 = vadd.f32 %v3738_v12, %v2289_v31 }
 0x2cd   : > { %v2357_v49 = vpack.c.bf16 %v2325_v17, %v2325_v17  ;;  %v2250_v54 = vpop.f32.mrf.mxu0 }
 0x2ce   : > { %v2111_v27 = vpop.f32.mrf.mxu3 }
 0x2cf   : > { %2390 = vst.msk [vmem:[%s3750_s20 + $0x68] sm:$0xf] %vm2363_vm9, %v2357_v49  ;;  %v2151_v9 = vadd.f32 %v2111_v27, %v1985_v30  ;;  %v1813_v62 = vpop.f32.mrf.mxu1 }
 0x2d0   : > { %v1850_v46 = vadd.f32 %v1813_v62, %v3717_v21 }
 0x2d1   : > { %v2290_v4 = vadd.f32 %v2250_v54, %v2151_v9  ;;  %v1948_v33 = vpop.f32.mrf.mxu2 }
 0x2d2   : > { %v1986_v40 = vadd.f32 %v1948_v33, %v1849_v5 }
 0x2d3   : > { %v2326_v24 = vadd.f32 %v3738_v12, %v2290_v4 }
 0x2d5   : > { %v2358_v23 = vpack.c.bf16 %v2326_v24, %v2326_v24  ;;  %v2253_v3 = vpop.f32.mrf.mxu0 }
 0x2d6   : > { %v2114_v2 = vpop.f32.mrf.mxu3 }
 0x2d7   : > { %2391 = vst.msk [vmem:[%s3750_s20 + $0x6c] sm:$0xf] %vm2363_vm9, %v2358_v23  ;;  %v2152_v44 = vadd.f32 %v2114_v2, %v1986_v40  ;;  %v1816_v47 = vpop.f32.mrf.mxu1 }
 0x2d8   : > { %v1851_v45 = vadd.f32 %v1816_v47, %v3726_v7 }
 0x2d9   : > { %v2291_v34 = vadd.f32 %v2253_v3, %v2152_v44  ;;  %v1950_v0 = vpop.f32.mrf.mxu2 }
 0x2da   : > { %v1987_v59 = vadd.f32 %v1950_v0, %v1850_v46 }
 0x2db   : > { %v2327_v35 = vadd.f32 %v3738_v12, %v2291_v34 }
 0x2dd   : > { %v2359_v22 = vpack.c.bf16 %v2327_v35, %v2327_v35  ;;  %v2255_v15 = vpop.f32.mrf.mxu0 }
 0x2de   : > { %v2116_v42 = vpop.f32.mrf.mxu3 }
 0x2df   : > { %2392 = vst.msk [vmem:[%s3750_s20 + $0x70] sm:$0xf] %vm2363_vm9, %v2359_v22  ;;  %v2153_v16 = vadd.f32 %v2116_v42, %v1987_v59  ;;  %v1818_v53 = vpop.f32.mrf.mxu1 }
 0x2e0   : > { %v1852_v63 = vadd.f32 %v1818_v53, %v3731_v36 }
 0x2e1   : > { %v2292_v39 = vadd.f32 %v2255_v15, %v2153_v16  ;;  %v1953_v13 = vpop.f32.mrf.mxu2 }
 0x2e2   : > { %v1988_v21 = vadd.f32 %v1953_v13, %v1851_v45 }
 0x2e3   : > { %v2328_v8 = vadd.f32 %v3738_v12, %v2292_v39 }
 0x2e5   : > { %v2360_v57 = vpack.c.bf16 %v2328_v8, %v2328_v8  ;;  %v2258_v25 = vpop.f32.mrf.mxu0 }
 0x2e6   : > { %v2119_v50 = vpop.f32.mrf.mxu3 }
 0x2e7   : > { %2393 = vst.msk [vmem:[%s3750_s20 + $0x74] sm:$0xf] %vm2363_vm9, %v2360_v57  ;;  %v2154_v61 = vadd.f32 %v2119_v50, %v1988_v21 }
 0x2e9   : > { %v2293_v20 = vadd.f32 %v2258_v25, %v2154_v61  ;;  %v1955_v41 = vpop.f32.mrf.mxu2 }
 0x2ea   : > { %v1989_v7 = vadd.f32 %v1955_v41, %v1852_v63 }
 0x2eb   : > { %v2329_v37 = vadd.f32 %v3738_v12, %v2293_v20 }
 0x2ed   : > { %v2361_v19 = vpack.c.bf16 %v2329_v37, %v2329_v37  ;;  %v2260_v43 = vpop.f32.mrf.mxu0 }
 0x2ee   : > { %v2121_v58 = vpop.f32.mrf.mxu3 }
 0x2ef   : > { %2394 = vst.msk [vmem:[%s3750_s20 + $0x78] sm:$0xf] %vm2363_vm9, %v2361_v19  ;;  %v2155_v6 = vadd.f32 %v2121_v58, %v1989_v7 }
 0x2f1   : > { %v2294_v1 = vadd.f32 %v2260_v43, %v2155_v6 }
 0x2f3   : > { %v2330_v55 = vadd.f32 %v3738_v12, %v2294_v1 }
 0x2f5   : > { %v2362_v38 = vpack.c.bf16 %v2330_v55, %v2330_v55 }
 0x2f7   : > { %2395 = vst.msk [vmem:[%s3750_s20 + $0x7c] sm:$0xf] %vm2363_vm9, %v2362_v38 }
 0x2f8 PF: > { %s13_s12 = sadd.s32 1, %s2753_s12  }
 0x2f9   : > { %p10_p4 = scmp.ge.s32.totalorder %s13_s12, 4  }
 0x2fb   :  { %12 = sbr.rel (!%p10_p4) target bundleno = 1 (0x1), region = 62 }

</bundles_post_ra>
